<compile_context>
chip_gen: v7x
topology: tpu7x:2x2x1
jax: 0.10.0
libtpu: 0.0.40
codegen_flags: <defaults>
</compile_context>

<pallas_src>
import jax
import jax.numpy as jnp
from jax.experimental import pallas as pl
from jax.experimental.pallas import tpu as pltpu


def _round_up(n: int, m: int) -> int:
    return ((n + m - 1) // m) * m


def _num_tensorcores() -> int:
    """Best-effort count of TensorCores per chip (2 on v7x, 1 on v5e/v6e).

    Defensive: any failure falls back to 1 (i.e. no grid-splitting clamp)."""
    try:
        info = pltpu.get_tpu_info()
        for attr in ("num_cores", "num_tensorcores", "tensorcore_count",
                     "cores_per_chip", "num_cores_per_chip", "core_count"):
            v = getattr(info, attr, None)
            if isinstance(v, int) and 1 <= v <= 8:
                return v
        name = str(getattr(info, "chip_version", "")).lower()
        if "7" in name:
            return 2
    except Exception:
        pass
    try:
        kind = jax.devices()[0].device_kind.lower()
        if "v7" in kind:
            return 2
    except Exception:
        pass
    return 1


def _select_tiling(batch: int, block_cols_request: int, num_cores: int):
    """Pick (block_cols, padded_batch, n_steps).

    - block_cols is always a multiple of 128.
    - padded_batch - round_up(batch,128) < n_steps*128 (bounded waste).
    - On single-TC chips the whole (lane-padded) batch goes in one tile when
      it fits the request; on multi-TC chips keep >= 2 steps per core when the
      batch is large enough (lane_groups >= 2*num_cores)."""
    lane_groups = _round_up(batch, 128) // 128
    target_groups = max(1, _round_up(max(1, block_cols_request), 128) // 128)
    if num_cores > 1 and lane_groups >= 2 * num_cores:
        target_groups = min(target_groups, lane_groups // (2 * num_cores))
        target_groups = max(1, target_groups)
    n_steps = -(-lane_groups // target_groups)            # cdiv
    groups_per_tile = -(-lane_groups // n_steps)          # cdiv
    block_cols = groups_per_tile * 128
    padded_batch = n_steps * block_cols
    return block_cols, padded_batch, n_steps


def _feature_nn_kernel(xT_ref, w1_ref, b1_ref, w2_ref, b2_ref,
                       w3_ref, b3_ref, w4_ref, out_ref):
    """Fused MLP on one column tile of the transposed input.

    h = cos(W1 @ x + b1); h = cos(W2 @ h + b2); h = cos(W3 @ h + b3)
    out = W4 @ h                                  (no bias; dropout = identity)
    """
    h = xT_ref[...]                                               # (F,  C)
    h = jnp.cos(jnp.dot(w1_ref[...], h,
                        preferred_element_type=jnp.float32) + b1_ref[...])
    h = jnp.cos(jnp.dot(w2_ref[...], h,
                        preferred_element_type=jnp.float32) + b2_ref[...])
    h = jnp.cos(jnp.dot(w3_ref[...], h,
                        preferred_element_type=jnp.float32) + b3_ref[...])
    out_ref[...] = jnp.dot(w4_ref[...], h,
                           preferred_element_type=jnp.float32
                           ).astype(out_ref.dtype)                # (1,  C)


def feature_nn_forward(x, params, *, block_cols=16384):
    """x: (B, F) float32. Returns (B, 1, 1) matching the PyTorch forward
    applied to an input of shape (B, F)."""
    w1, b1, w2, b2, w3, b3, w4 = params      # (out,in) weights, (out,1) biases
    B, F = x.shape
    U, H1, H2 = w1.shape[0], w2.shape[0], w3.shape[0]

    num_cores = _num_tensorcores()
    block_cols, Bp, n_steps = _select_tiling(B, block_cols, num_cores)
    grid = (n_steps,)

    # --- transpose + zero-pad to a multiple of 128 (single cheap layout pass;
    #     padded columns compute cos(bias) and are discarded) ----------------
    xT = jnp.transpose(x.astype(jnp.float32))                     # (F, B)
    if Bp != B:
        xT = jnp.pad(xT, ((0, 0), (0, Bp - B)))

    def col_map(i):
        return (0, i)

    def const_map(i):
        return (0, 0)

    # Advisory cost model: 2*(F*U + U*H1 + H1*H2 + H2) flops and
    # (U+H1+H2) cos evaluations per padded column.
    flops_per_col = 2 * (F * U + U * H1 + H1 * H2 + H2 * 1)
    transc_per_col = U + H1 + H2
    weight_bytes = int(sum(int(p.size) for p in params)) * 4
    cost = pl.CostEstimate(
        flops=flops_per_col * Bp,
        transcendentals=transc_per_col * Bp,
        bytes_accessed=(F + 1) * 4 * Bp + weight_bytes)

    out = pl.pallas_call(
        _feature_nn_kernel,
        out_shape=jax.ShapeDtypeStruct((1, Bp), jnp.float32),
        grid_spec=pltpu.PrefetchScalarGridSpec(
            num_scalar_prefetch=0,
            grid=grid,
            in_specs=[
                pl.BlockSpec((F, block_cols), col_map),    # x^T column tile
                pl.BlockSpec((U, F), const_map),           # W1
                pl.BlockSpec((U, 1), const_map),           # b1
                pl.BlockSpec((H1, U), const_map),          # W2
                pl.BlockSpec((H1, 1), const_map),          # b2
                pl.BlockSpec((H2, H1), const_map),         # W3
                pl.BlockSpec((H2, 1), const_map),          # b3
                pl.BlockSpec((1, H2), const_map),          # W4 (no bias)
            ],
            out_specs=pl.BlockSpec((1, block_cols), col_map),
        ),
        compiler_params=pltpu.CompilerParams(
            dimension_semantics=("parallel",),
            vmem_limit_bytes=32 * 1024 * 1024),
        cost_estimate=cost,
    )(xT, w1, b1, w2, b2, w3, b3, w4)

    # unsqueeze(1) in the PyTorch forward makes the result (B, 1, 1).
    return out[0, :B].reshape(B, 1, 1)


def init_params(key, input_shape, num_units, hidden_sizes):
    """Deterministic Linear-layer init (uniform, PyTorch-style fan-in bound).
    Weights stored (out_features, in_features), biases (out_features, 1)."""
    sizes = [input_shape, num_units] + list(hidden_sizes)
    params = []
    k = key
    for fin, fout in zip(sizes[:-1], sizes[1:]):
        k, kw, kb = jax.random.split(k, 3)
        bound = 1.0 / jnp.sqrt(jnp.float32(fin))
        w = jax.random.uniform(kw, (fout, fin), jnp.float32, -bound, bound)
        b = jax.random.uniform(kb, (fout, 1), jnp.float32, -bound, bound)
        params += [w, b]
    # final Linear(hidden_sizes[-1], 1, bias=False)
    k, kw = jax.random.split(k)
    fin = sizes[-1]
    bound = 1.0 / jnp.sqrt(jnp.float32(fin))
    w_last = jax.random.uniform(kw, (1, fin), jnp.float32, -bound, bound)
    params.append(w_last)
    return tuple(params)


def _reference(x, params):
    w1, b1, w2, b2, w3, b3, w4 = params
    h = jnp.cos(x @ w1.T + b1.T)
    h = jnp.cos(h @ w2.T + b2.T)
    h = jnp.cos(h @ w3.T + b3.T)
    return (h @ w4.T).reshape(x.shape[0], 1, 1)


if __name__ == "__main__":
    # Small shapes consistent with the module:
    #   input_shape=4, num_units=32, hidden_sizes=[64, 32]
    F, U = 4, 32
    hidden_sizes = [64, 32]

    key = jax.random.PRNGKey(0)
    kx1, kx2, kx3, kp = jax.random.split(key, 4)
    params = init_params(kp, F, U, hidden_sizes)

    # Case 1: tiny batch (lane-padded 8 -> 128, single grid step).
    B1 = 8
    x1 = jax.random.normal(kx1, (B1, F), jnp.float32)
    out1 = jax.block_until_ready(feature_nn_forward(x1, params))
    ref1 = _reference(x1, params)
    assert out1.shape == (B1, 1, 1)
    assert jnp.allclose(out1, ref1, atol=1e-5, rtol=1e-5)

    # Case 2: non-multiple batch (200 -> 256; one 256-wide tile on single-TC).
    B2 = 200
    x2 = jax.random.normal(kx2, (B2, F), jnp.float32)
    out2 = jax.block_until_ready(feature_nn_forward(x2, params))
    ref2 = _reference(x2, params)
    assert out2.shape == (B2, 1, 1)
    assert jnp.allclose(out2, ref2, atol=1e-5, rtol=1e-5)

    # Case 3: multi-step grid with a non-128-multiple block_cols request
    # (rounded to 256 -> 4 steps over 1000 -> 1024 padded columns).
    B3 = 1000
    x3 = jax.random.normal(kx3, (B3, F), jnp.float32)
    out3 = jax.block_until_ready(feature_nn_forward(x3, params, block_cols=200))
    ref3 = _reference(x3, params)
    assert out3.shape == (B3, 1, 1)
    assert jnp.allclose(out3, ref3, atol=1e-5, rtol=1e-5)

    print("KERNEL_OK")
</pallas_src>

<mosaic_0001>
module attributes {stable_mosaic.version = 11 : i64} {
  func.func @_feature_nn_kernel(%arg0: i32, %arg1: memref<4x128xf32, #tpu.memory_space<vmem>>, %arg2: memref<32x4xf32, #tpu.memory_space<vmem>>, %arg3: memref<32x1xf32, #tpu.memory_space<vmem>>, %arg4: memref<64x32xf32, #tpu.memory_space<vmem>>, %arg5: memref<64x1xf32, #tpu.memory_space<vmem>>, %arg6: memref<32x64xf32, #tpu.memory_space<vmem>>, %arg7: memref<32x1xf32, #tpu.memory_space<vmem>>, %arg8: memref<1x32xf32, #tpu.memory_space<vmem>>, %arg9: memref<1x128xf32, #tpu.memory_space<vmem>>) attributes {dimension_semantics = [#tpu.dimension_semantics<parallel>], iteration_bounds = array<i64: 1>, scalar_prefetch = 0 : i64, scratch_operands = 0 : i64, tpu.core_type = #tpu.core_type<tc>, window_params = [{transform_indices = @transform_0, window_bounds = array<i64: 4, 128>}, {pipeline_mode = #tpu.pipeline_mode<synchronous>, transform_indices = @transform_1, window_bounds = array<i64: 32, 4>}, {pipeline_mode = #tpu.pipeline_mode<synchronous>, transform_indices = @transform_2, window_bounds = array<i64: 32, 1>}, {pipeline_mode = #tpu.pipeline_mode<synchronous>, transform_indices = @transform_3, window_bounds = array<i64: 64, 32>}, {pipeline_mode = #tpu.pipeline_mode<synchronous>, transform_indices = @transform_4, window_bounds = array<i64: 64, 1>}, {pipeline_mode = #tpu.pipeline_mode<synchronous>, transform_indices = @transform_5, window_bounds = array<i64: 32, 64>}, {pipeline_mode = #tpu.pipeline_mode<synchronous>, transform_indices = @transform_6, window_bounds = array<i64: 32, 1>}, {pipeline_mode = #tpu.pipeline_mode<synchronous>, transform_indices = @transform_7, window_bounds = array<i64: 1, 32>}, {transform_indices = @transform_8, window_bounds = array<i64: 1, 128>}]} {
    %c0 = arith.constant 0 : index
    %c0_0 = arith.constant 0 : index
    %0 = vector.load %arg1[%c0, %c0_0] : memref<4x128xf32, #tpu.memory_space<vmem>>, vector<4x128xf32>
    %c0_1 = arith.constant 0 : index
    %c0_2 = arith.constant 0 : index
    %1 = vector.load %arg2[%c0_1, %c0_2] : memref<32x4xf32, #tpu.memory_space<vmem>>, vector<32x4xf32>
    %cst = arith.constant dense<0.000000e+00> : vector<32x128xf32>
    %2 = tpu.matmul %1, %0, %cst {dimension_numbers = #tpu.dot_dimension_numbers<[1], [0], [0], [1], [0, 0, 1, 1], [], []>} : vector<32x4xf32>, vector<4x128xf32>, vector<32x128xf32> -> vector<32x128xf32>
    %c0_3 = arith.constant 0 : index
    %c0_4 = arith.constant 0 : index
    %3 = vector.load %arg3[%c0_3, %c0_4] : memref<32x1xf32, #tpu.memory_space<vmem>>, vector<32x1xf32>
    %4 = vector.broadcast %3 : vector<32x1xf32> to vector<32x128xf32>
    %5 = arith.addf %2, %4 : vector<32x128xf32>
    %6 = math.cos %5 : vector<32x128xf32>
    %c0_5 = arith.constant 0 : index
    %c0_6 = arith.constant 0 : index
    %7 = vector.load %arg4[%c0_5, %c0_6] : memref<64x32xf32, #tpu.memory_space<vmem>>, vector<64x32xf32>
    %cst_7 = arith.constant dense<0.000000e+00> : vector<64x128xf32>
    %8 = tpu.matmul %7, %6, %cst_7 {dimension_numbers = #tpu.dot_dimension_numbers<[1], [0], [0], [1], [0, 0, 1, 1], [], []>} : vector<64x32xf32>, vector<32x128xf32>, vector<64x128xf32> -> vector<64x128xf32>
    %c0_8 = arith.constant 0 : index
    %c0_9 = arith.constant 0 : index
    %9 = vector.load %arg5[%c0_8, %c0_9] : memref<64x1xf32, #tpu.memory_space<vmem>>, vector<64x1xf32>
    %10 = vector.broadcast %9 : vector<64x1xf32> to vector<64x128xf32>
    %11 = arith.addf %8, %10 : vector<64x128xf32>
    %12 = math.cos %11 : vector<64x128xf32>
    %c0_10 = arith.constant 0 : index
    %c0_11 = arith.constant 0 : index
    %13 = vector.load %arg6[%c0_10, %c0_11] : memref<32x64xf32, #tpu.memory_space<vmem>>, vector<32x64xf32>
    %cst_12 = arith.constant dense<0.000000e+00> : vector<32x128xf32>
    %14 = tpu.matmul %13, %12, %cst_12 {dimension_numbers = #tpu.dot_dimension_numbers<[1], [0], [0], [1], [0, 0, 1, 1], [], []>} : vector<32x64xf32>, vector<64x128xf32>, vector<32x128xf32> -> vector<32x128xf32>
    %c0_13 = arith.constant 0 : index
    %c0_14 = arith.constant 0 : index
    %15 = vector.load %arg7[%c0_13, %c0_14] : memref<32x1xf32, #tpu.memory_space<vmem>>, vector<32x1xf32>
    %16 = vector.broadcast %15 : vector<32x1xf32> to vector<32x128xf32>
    %17 = arith.addf %14, %16 : vector<32x128xf32>
    %18 = math.cos %17 : vector<32x128xf32>
    %c0_15 = arith.constant 0 : index
    %c0_16 = arith.constant 0 : index
    %19 = vector.load %arg8[%c0_15, %c0_16] : memref<1x32xf32, #tpu.memory_space<vmem>>, vector<1x32xf32>
    %cst_17 = arith.constant dense<0.000000e+00> : vector<1x128xf32>
    %20 = tpu.matmul %19, %18, %cst_17 {dimension_numbers = #tpu.dot_dimension_numbers<[1], [0], [0], [1], [0, 0, 1, 1], [], []>} : vector<1x32xf32>, vector<32x128xf32>, vector<1x128xf32> -> vector<1x128xf32>
    %c0_18 = arith.constant 0 : index
    %c0_19 = arith.constant 0 : index
    %21 = vector.load %arg9[%c0_18, %c0_19] : memref<1x128xf32, #tpu.memory_space<vmem>>, vector<1x128xf32>
    tpu.vector_store %arg9[%c0_18, %c0_19], %20 {strides = array<i32>} : memref<1x128xf32, #tpu.memory_space<vmem>>, vector<1x128xf32>,
    return
  }
  func.func @transform_0(%arg0: i32) -> (i32, i32) {
    %c0_i32 = arith.constant 0 : i32
    %c0_i32_0 = arith.constant 0 : i32
    return %c0_i32, %arg0 : i32, i32
  }
  func.func @transform_1(%arg0: i32) -> (i32, i32) {
    %c0_i32 = arith.constant 0 : i32
    %c0_i32_0 = arith.constant 0 : i32
    %c0_i32_1 = arith.constant 0 : i32
    return %c0_i32, %c0_i32_0 : i32, i32
  }
  func.func @transform_2(%arg0: i32) -> (i32, i32) {
    %c0_i32 = arith.constant 0 : i32
    %c0_i32_0 = arith.constant 0 : i32
    %c0_i32_1 = arith.constant 0 : i32
    return %c0_i32, %c0_i32_0 : i32, i32
  }
  func.func @transform_3(%arg0: i32) -> (i32, i32) {
    %c0_i32 = arith.constant 0 : i32
    %c0_i32_0 = arith.constant 0 : i32
    %c0_i32_1 = arith.constant 0 : i32
    return %c0_i32, %c0_i32_0 : i32, i32
  }
  func.func @transform_4(%arg0: i32) -> (i32, i32) {
    %c0_i32 = arith.constant 0 : i32
    %c0_i32_0 = arith.constant 0 : i32
    %c0_i32_1 = arith.constant 0 : i32
    return %c0_i32, %c0_i32_0 : i32, i32
  }
  func.func @transform_5(%arg0: i32) -> (i32, i32) {
    %c0_i32 = arith.constant 0 : i32
    %c0_i32_0 = arith.constant 0 : i32
    %c0_i32_1 = arith.constant 0 : i32
    return %c0_i32, %c0_i32_0 : i32, i32
  }
  func.func @transform_6(%arg0: i32) -> (i32, i32) {
    %c0_i32 = arith.constant 0 : i32
    %c0_i32_0 = arith.constant 0 : i32
    %c0_i32_1 = arith.constant 0 : i32
    return %c0_i32, %c0_i32_0 : i32, i32
  }
  func.func @transform_7(%arg0: i32) -> (i32, i32) {
    %c0_i32 = arith.constant 0 : i32
    %c0_i32_0 = arith.constant 0 : i32
    %c0_i32_1 = arith.constant 0 : i32
    return %c0_i32, %c0_i32_0 : i32, i32
  }
  func.func @transform_8(%arg0: i32) -> (i32, i32) {
    %c0_i32 = arith.constant 0 : i32
    %c0_i32_0 = arith.constant 0 : i32
    return %c0_i32, %arg0 : i32, i32
  }
}

</mosaic_0001>

<bundles_post_ra>
// kernel: tpu_custom_call.1
= control target key start
LH: loop header
LB: loop body
LE: loop exit
PB: predicated region body
PF: predicated region fallthrough
CT: control target
= control target key end

     0   :  { %vm72_vm0 = vcmask 1043456   ;;  %vm59_vm1 = vcmask 31744   ;;  %v2582_v5 = vmov 0   ;;  %s4028_s0 = inlined_call_operand.vmem [shape: f32[4,128], index: 0, kind: input, shape index: {}]   ;;  %s4029_s1 = inlined_call_operand.vmem [shape: f32[32,4], index: 1, kind: input, shape index: {}]   ;;  %s4030_s2 = inlined_call_operand.vmem [shape: f32[32,1], index: 2, kind: input, shape index: {}]   ;;  %s4031_s3 = inlined_call_operand.vmem [shape: f32[64,32], index: 3, kind: input, shape index: {}]   ;;  %s4032_s4 = inlined_call_operand.vmem [shape: f32[64,1], index: 4, kind: input, shape index: {}]   ;;  %s4033_s5 = inlined_call_operand.vmem [shape: f32[32,64], index: 5, kind: input, shape index: {}]   ;;  %s4034_s6 = inlined_call_operand.vmem [shape: f32[32,1], index: 6, kind: input, shape index: {}]   ;;  %s4035_s7 = inlined_call_operand.vmem [shape: f32[1,32], index: 7, kind: input, shape index: {}]   ;;  %s4036_s8 = inlined_call_operand.hbm [shape: f32[1,128], index: 8, kind: output, shape index: {}]  }
   0x1   :  { %v30_v0 = vld [vmem:[%s4028_s0] sm:$0xf]  ;;  %v32_v2 = vld [vmem:[%s4029_s1 + $0x8] sm:$0xff]  ;;  %v33_v3 = vld [vmem:[%s4029_s1 + $0x10] sm:$0xff]  ;;  %2492 = vset.pattern.permute.xlu0 %v2582_v5  ;;  %2493 = vset.pattern.permute.xlu1 %v2582_v5 }
   0x2   :  { %v31_v1 = vld [vmem:[%s4029_s1] sm:$0xff]  ;;  %2326 = vmatprep.subr.msk.mxu0 %vm72_vm0, %v30_v0  ;;  %v37_v6 = vld [vmem:[%s4030_s2 + $0x10] sm:$0xff]  ;;  %v34_v7 = vld [vmem:[%s4029_s1 + $0x18] sm:$0xff] }
   0x3   :  { %2328 = vmatprep.mubr.msk.f32.mxu0 %vm59_vm1, %v31_v1  ;;  %v35_v4 = vld [vmem:[%s4030_s2] sm:$0xff]  ;;  %2327 = vmatpush3.msk.msra.mxu0 %vm72_vm0, %v30_v0  ;;  %v36_v8 = vld [vmem:[%s4030_s2 + $0x8] sm:$0xff]  ;;  %v38_v9 = vld [vmem:[%s4030_s2 + $0x18] sm:$0xff] }
   0x4   :  { %2329 = vmatmul.mubr.msk.f32.vlgmr.msra.gmra.mrb[0].mxu0 %vm59_vm1, %v32_v2  ;;  %41 = vperm.xlu0 %2492, %v35_v4  }
   0x5   :  { %2331 = vmatprep.mubr.msk.f32.mxu0 %vm59_vm1, %v33_v3  ;;  %51 = vperm.xlu1 %2493, %v37_v6  }
   0x8   :  { %2332 = vmatmul.mubr.msk.f32.gmra.mrb[2].mxu0 %vm59_vm1, %v34_v7  ;;  %46 = vperm.xlu0 %2492, %v36_v8  }
   0x9   :  { %13 = vsyncpa [#allocation3], 0  ;;  %v581_v10 = vld [vmem:[%s4032_s4] sm:$0xff]  ;;  %56 = vperm.xlu1 %2493, %v38_v9   ;;  %v582_v11 = vld [vmem:[%s4032_s4 + $0x8] sm:$0xff]  ;;  %v2583_v0 = vmov 683565275  }
   0xa   :  { %v583_v12 = vld [vmem:[%s4032_s4 + $0x10] sm:$0xff]  ;;  %v584_v13 = vld [vmem:[%s4032_s4 + $0x18] sm:$0xff]  ;;  %v585_v14 = vld [vmem:[%s4032_s4 + $0x20] sm:$0xff]  ;;  %v2584_v2 = vmov 2475754826   ;;  %vm629_vm14 = vcmask 261120  }
   0xb   :  { %v586_v15 = vld [vmem:[%s4032_s4 + $0x28] sm:$0xff]  ;;  %v587_v16 = vld [vmem:[%s4032_s4 + $0x30] sm:$0xff]  ;;  %v588_v17 = vld [vmem:[%s4032_s4 + $0x38] sm:$0xff]  ;;  %v4043_v5 = vmov 2131351028   ;;  %s2592_s18 = smov [#allocation2]  }
   0xc   :  { %591 = vperm.xlu0 %2492, %v581_v10   ;;  %v1587_v18 = vld [vmem:[%s4034_s6] sm:$0xff]  ;;  %v1588_v19 = vld [vmem:[%s4034_s6 + $0x8] sm:$0xff]  ;;  %v1589_v20 = vld [vmem:[%s4034_s6 + $0x10] sm:$0xff]  ;;  %v4041_v7 = vmov 2102212464   ;;  %s2202_s19 = sshll.u32 %s2592_s18, 4  ;;  %s2203_s19 = int_to_ptr.vmem [resolvable:$true] %s2202_s19 }
   0xd   :  { %596 = vperm.xlu1 %2493, %v582_v11   ;;  %v1590_v21 = vld [vmem:[%s4034_s6 + $0x18] sm:$0xff]  ;;  %v2587_v9 = vmov 920167782   ;;  %s2558_s20 = scalar_lea.vmem %s2203_s19, 16  ;;  %s2562_s4 = scalar_lea.vmem %s2203_s19, 32 }
   0xe   :  { %p2559_p0 = scmp.ne.s32.totalorder %s2203_s19, %s2558_s20  ;;  %p2563_p1 = scmp.lt.s32.totalorder %s2203_s19, %s2203_s19 }
   0xf   :  { %p2564_p2 = scmp.lt.s32.totalorder %s2562_s4, %s2558_s20 }
  0x10   :  { %601 = vperm.xlu0 %2492, %v583_v12  }
  0x11   :  { %606 = vperm.xlu1 %2493, %v584_v13   ;;  %p2565_p3 = por %p2564_p2, %p2563_p1 }
  0x13   :  { %p2566_p4 = pnand %p2565_p3, %p2559_p0 }
  0x14   :  { %611 = vperm.xlu0 %2492, %v585_v14  }
  0x15   :  { %616 = vperm.xlu1 %2493, %v586_v15  }
  0x18   :  { %621 = vperm.xlu0 %2492, %v587_v16   ;;  %v4039_v16 = vmov 1326507024  }
  0x19   :  { %626 = vperm.xlu1 %2493, %v588_v17  }
  0x1c   :  { %1593 = vperm.xlu0 %2492, %v1587_v18  }
  0x1d   :  { %1598 = vperm.xlu1 %2493, %v1588_v19  }
  0x20   :  { %1603 = vperm.xlu0 %2492, %v1589_v20  }
  0x21   :  { %1608 = vperm.xlu1 %2493, %v1590_v21  }
  0x83   :  { %v42_v22 = vpop.permute.xlu0 %41 }
  0x84   :  { %v52_v23 = vpop.permute.xlu1 %51 }
  0x87   :  { %v47_v24 = vpop.permute.xlu0 %46 }
  0x88   :  { %v57_v31 = vpop.permute.xlu1 %56 }
  0xd7   :  { %v2330_v25 = vpop.f32.mrb[0].mxu0 }
  0xd8   :  { %v2705_v26 = vadd.f32 %v2330_v25, %v47_v24  ;;  %v142_v27 = vpop.f32.mrb[1].mxu0 }
  0xd9   :  { %v2707_v28 = vadd.f32 %v142_v27, %v42_v22 }
  0xda   :  { %v264_v29 = vand.u32 2147483647, %v2705_v26  ;;  %v267_v30 = vand.u32 2139095040, %v2705_v26 }
  0xdb   :  { %v161_v32 = vand.u32 2147483647, %v2707_v28  ;;  %v164_v33 = vand.u32 2139095040, %v2707_v28  ;;  %v2333_v34 = vpop.f32.mrb[2].mxu0 }
  0xdc   :  { %v268_v35 = vshrl.u32 %v267_v30, 23  ;;  %v271_v36 = vand.u32 8388607, %v264_v29  ;;  %v2715_v37 = vadd.f32 %v2333_v34, %v57_v31  ;;  %v152_v38 = vpop.f32.mrb[3].mxu0 }
  0xdd   :  { %v165_v39 = vshrl.u32 %v164_v33, 23  ;;  %v168_v40 = vand.u32 8388607, %v161_v32  ;;  %v2721_v45 = vadd.f32 %v152_v38, %v52_v23 }
  0xde   :  { %v2219_v41 = vadd.s32 4294967169, %v268_v35  ;;  %v470_v42 = vand.u32 2147483647, %v2715_v37  ;;  %v473_v44 = vand.u32 2139095040, %v2715_v37  ;;  %v272_v46 = vor.u32 8388608, %v271_v36 }
  0xdf   :  { %v2215_v43 = vadd.s32 4294967169, %v165_v39  ;;  %v169_v48 = vor.u32 8388608, %v168_v40  ;;  %v367_v54 = vand.u32 2147483647, %v2721_v45 }
  0xe0   :  { %v274_v47 = vadd.s32 1, %v2219_v41  ;;  %v474_v50 = vshrl.u32 %v473_v44, 23  ;;  %v2725_v51 = vand.u32 8388607, %v470_v42  ;;  %v2728_v57 = vshll.u32 %v272_v46, 8 }
  0xe1   :  { %v171_v49 = vadd.s32 1, %v2215_v43  ;;  %v2732_v61 = vshll.u32 %v169_v48, 8 }
  0xe2   :  { %vm275_vm2 = vcmp.gt.s32.totalorder %v274_v47, 0  ;;  %v2227_v53 = vadd.s32 4294967169, %v474_v50  ;;  %v478_v62 = vor.u32 8388608, %v2725_v51 }
  0xe3   :  { %v276_v52 = vsel %vm275_vm2, %v274_v47, 0  ;;  %vm172_vm3 = vcmp.gt.s32.totalorder %v171_v49, 0 }
  0xe4   :  { %v277_v55 = vshrl.u32 %v276_v52, 5  ;;  %v278_v56 = vand.u32 31, %v276_v52  ;;  %v173_v58 = vsel %vm172_vm3, %v171_v49, 0  ;;  %v2737_v4 = vadd.s32 1, %v2227_v53 }
  0xe5   :  { %v2730_v59 = vshrl.u32 %v173_v58, 5  ;;  %v175_v60 = vand.u32 31, %v173_v58 }
  0xe6   :  { %v279_v63 = vsub.s32 32, %v278_v56  ;;  %v281_v1 = vshll.u32 %v2583_v0, %v278_v56  ;;  %v284_v3 = vshll.u32 %v2584_v2, %v278_v56  ;;  %v287_v6 = vshll.u32 %v4043_v5, %v278_v56 }
  0xe7   :  { %v290_v8 = vshll.u32 %v4041_v7, %v278_v56  ;;  %v293_v10 = vshll.u32 %v2587_v9, %v278_v56  ;;  %vm296_vm4 = vcmp.lt.s32.totalorder %v277_v55, 1  ;;  %vm297_vm5 = vcmp.lt.s32.totalorder %v277_v55, 2 }
  0xe8   :  { %v282_v11 = vshrl.u32 %v2584_v2, %v279_v63  ;;  %v285_v12 = vshrl.u32 %v4043_v5, %v279_v63  ;;  %v288_v13 = vshrl.u32 %v4041_v7, %v279_v63  ;;  %v280_v14 = vshrl.u32 %v2583_v0, %v279_v63 }
  0xe9   :  { %v291_v15 = vshrl.u32 %v2587_v9, %v279_v63  ;;  %v294_v17 = vshrl.u32 %v4039_v16, %v279_v63  ;;  %vm298_vm6 = vcmp.lt.s32.totalorder %v277_v55, 3  ;;  %v176_v21 = vsub.s32 32, %v175_v60 }
  0xea   :  { %v283_v18 = vor.u32 %v282_v11, %v281_v1  ;;  %v286_v19 = vor.u32 %v285_v12, %v284_v3  ;;  %v289_v20 = vor.u32 %v288_v13, %v287_v6  ;;  %vm299_vm7 = vcmp.lt.s32.totalorder %v277_v55, 4 }
  0xeb   :  { %v292_v22 = vor.u32 %v291_v15, %v290_v8  ;;  %v295_v23 = vor.u32 %v294_v17, %v293_v10  ;;  %v178_v24 = vshll.u32 %v2583_v0, %v175_v60  ;;  %v181_v36 = vshll.u32 %v2584_v2, %v175_v60 }
  0xec   :  { %v300_v25 = vsel %vm296_vm4, %v280_v14, %v283_v18  ;;  %v301_v27 = vsel %vm299_vm7, %v289_v20, 2102212464  ;;  %v304_v30 = vsel %vm296_vm4, %v283_v18, %v286_v19  ;;  %v308_v31 = vsel %vm296_vm4, %v286_v19, %v289_v20 }
  0xed   :  { %v302_v33 = vsel %vm298_vm6, %v286_v19, %v301_v27  ;;  %v305_v34 = vsel %vm299_vm7, %v292_v22, 920167782  ;;  %v309_v35 = vsel %vm299_vm7, %v295_v23, 1326507024  ;;  %v177_v40 = vshrl.u32 %v2583_v0, %v176_v21 }
  0xee   :  { %v306_v38 = vsel %vm298_vm6, %v289_v20, %v305_v34  ;;  %v310_v39 = vsel %vm298_vm6, %v292_v22, %v309_v35  ;;  %v179_v41 = vshrl.u32 %v2584_v2, %v176_v21  ;;  %v303_v43 = vsel %vm297_vm5, %v300_v25, %v302_v33 }
  0xef   :  { %v307_v44 = vsel %vm297_vm5, %v304_v30, %v306_v38  ;;  %v311_v46 = vsel %vm297_vm5, %v308_v31, %v310_v39  ;;  %v182_v47 = vshrl.u32 %v4043_v5, %v176_v21  ;;  %v184_v58 = vshll.u32 %v4043_v5, %v175_v60  ;;  %v573_v39 = vld [vmem:[%s4031_s3] sm:$0xff] }
  0xf0   :  { %v2763_v48 = vmul.u32.u64.low %v2728_v57, %v311_v46  ;;  %v2764_v49 = vmul.u32.u64.high %v2728_v57, %v311_v46, %v2763_v48  ;;  %v2767_v50 = vmul.u32.u64.low %v2728_v57, %v307_v44  ;;  %v2768_v52 = vmul.u32.u64.high %v2728_v57, %v307_v44, %v2767_v50  ;;  %2342 = vmatprep.mubr.msk.f32.mxu1 %vm629_vm14, %v573_v39 }
  0xf1   :  { %v180_v53 = vor.u32 %v179_v41, %v178_v24  ;;  %v183_v56 = vor.u32 %v182_v47, %v181_v36  ;;  %v185_v63 = vshrl.u32 %v4041_v7, %v176_v21  ;;  %v319_v1 = vmul.u32 %v2728_v57, %v303_v43 }
  0xf2   :  { %v187_v55 = vshll.u32 %v4041_v7, %v175_v60  ;;  %v188_v3 = vshrl.u32 %v2587_v9, %v176_v21  ;;  %v191_v6 = vshrl.u32 %v4039_v16, %v176_v21  ;;  %v190_v10 = vshll.u32 %v2587_v9, %v175_v60 }
  0xf3   :  { %v186_v8 = vor.u32 %v185_v63, %v184_v58  ;;  %vm193_vm8 = vcmp.lt.s32.totalorder %v2730_v59, 1  ;;  %vm194_vm9 = vcmp.lt.s32.totalorder %v2730_v59, 2  ;;  %vm321_vm10 = vc.u32 %v2764_v49, %v2767_v50 }
  0xf4   :  { %v322_v11 = vadd.s32 1, %v2768_v52  ;;  %v189_v12 = vor.u32 %v188_v3, %v187_v55  ;;  %vm195_vm11 = vcmp.lt.s32.totalorder %v2730_v59, 3  ;;  %v192_v57 = vor.u32 %v191_v6, %v190_v10 }
  0xf5   :  { %vm196_vm12 = vcmp.lt.s32.totalorder %v2730_v59, 4  ;;  %v197_v13 = vsel %vm193_vm8, %v177_v40, %v180_v53  ;;  %v201_v14 = vsel %vm193_vm8, %v180_v53, %v183_v56  ;;  %v205_v18 = vsel %vm193_vm8, %v183_v56, %v186_v8 }
  0xf6   :  { %v323_v15 = vsel %vm321_vm10, %v322_v11, %v2768_v52  ;;  %v198_v17 = vsel %vm196_vm12, %v186_v8, 2102212464  ;;  %v202_v60 = vsel %vm196_vm12, %v189_v12, 920167782  ;;  %v206_v22 = vsel %vm196_vm12, %v192_v57, 1326507024 }
  0xf7   :  { %v324_v19 = vadd.s32 %v323_v15, %v319_v1  ;;  %v199_v20 = vsel %vm195_vm11, %v183_v56, %v198_v17  ;;  %v203_v21 = vsel %vm195_vm11, %v186_v8, %v202_v60  ;;  %v207_v24 = vsel %vm195_vm11, %v189_v12, %v206_v22 }
  0xf8   :  { %v204_v23 = vsel %vm194_vm9, %v201_v14, %v203_v21  ;;  %vm481_vm13 = vcmp.gt.s32.totalorder %v2737_v4, 0  ;;  %v370_v25 = vand.u32 2139095040, %v2721_v45  ;;  %v208_v30 = vsel %vm194_vm9, %v205_v18, %v207_v24 }
  0xf9   :  { %v325_v27 = vadd.s32 536870912, %v324_v19  ;;  %v2791_v31 = vmul.u32.u64.low %v2732_v61, %v204_v23  ;;  %v2792_v33 = vmul.u32.u64.high %v2732_v61, %v204_v23, %v2791_v31  ;;  %v200_v34 = vsel %vm194_vm9, %v197_v13, %v199_v20 }
  0xfa   :  { %v2798_v35 = vmul.u32.u64.low %v2732_v61, %v208_v30  ;;  %v2799_v36 = vmul.u32.u64.high %v2732_v61, %v208_v30, %v2798_v35  ;;  %v482_v38 = vsel %vm481_vm13, %v2737_v4, 0  ;;  %v2809_v43 = vand.u32 8388607, %v367_v54 }
  0xfb   :  { %v2805_v40 = vshrl.u32 %v325_v27, 30  ;;  %v484_v41 = vand.u32 31, %v482_v38  ;;  %v2812_v59 = vadd.s32 %v2767_v50, %v2764_v49  ;;  %v2816_v44 = vshll.u32 %v478_v62, 8 }
  0xfc   :  { %v371_v46 = vshrl.u32 %v370_v25, 23  ;;  %v216_v47 = vmul.u32 %v2732_v61, %v200_v34  ;;  %v219_v48 = vadd.s32 1, %v2792_v33  ;;  %vm218_vm15 = vc.u32 %v2799_v36, %v2791_v31 }
  0xfd   :  { %v327_v4 = vshll.u32 %v2805_v40, 30  ;;  %v485_v52 = vsub.s32 32, %v484_v41  ;;  %v483_v49 = vshrl.u32 %v482_v38, 5  ;;  %v487_v50 = vshll.u32 %v2583_v0, %v484_v41 }
  0xfe   :  { %v490_v51 = vshll.u32 %v2584_v2, %v484_v41  ;;  %v220_v53 = vsel %vm218_vm15, %v219_v48, %v2792_v33  ;;  %v493_v61 = vshll.u32 %v4043_v5, %v484_v41  ;;  %v496_v55 = vshll.u32 %v4041_v7, %v484_v41 }
  0xff   :  { %v2826_v62 = vsub.s32 %v324_v19, %v327_v4  ;;  %v488_v56 = vshrl.u32 %v2584_v2, %v485_v52  ;;  %v221_v58 = vadd.s32 %v220_v53, %v216_v47  ;;  %v491_v63 = vshrl.u32 %v4043_v5, %v485_v52 }
 0x100   :  { %v494_v1 = vshrl.u32 %v4041_v7, %v485_v52  ;;  %v497_v8 = vshrl.u32 %v2587_v9, %v485_v52  ;;  %v499_v10 = vshll.u32 %v2587_v9, %v484_v41  ;;  %v500_v13 = vshrl.u32 %v4039_v16, %v485_v52 }
 0x101   :  { %v330_v3 = vsub.s32 0, %v2826_v62  ;;  %v489_v6 = vor.u32 %v488_v56, %v487_v50  ;;  %v222_v11 = vadd.s32 536870912, %v221_v58  ;;  %v492_v12 = vor.u32 %v491_v63, %v490_v51 }
 0x102   :  { %v495_v57 = vor.u32 %v494_v1, %v493_v61  ;;  %v486_v15 = vshrl.u32 %v2583_v0, %v485_v52  ;;  %v498_v17 = vor.u32 %v497_v8, %v496_v55  ;;  %v2223_v60 = vadd.s32 4294967169, %v371_v46 }
 0x103   :  { %v2220_v14 = vmin.u32 %v330_v3, %v2826_v62  ;;  %v2840_v18 = vshrl.u32 %v222_v11, 30  ;;  %v501_v19 = vor.u32 %v500_v13, %v499_v10  ;;  %vm502_vm0 = vcmp.lt.s32.totalorder %v483_v49, 1 }
 0x104   :  { %vm505_vm1 = vcmp.lt.s32.totalorder %v483_v49, 4  ;;  %vm503_vm2 = vcmp.lt.s32.totalorder %v483_v49, 2  ;;  %v510_v22 = vsel %vm502_vm0, %v489_v6, %v492_v12  ;;  %vm504_vm3 = vcmp.lt.s32.totalorder %v483_v49, 3 }
 0x105   :  { %v332_v20 = vclz %v2220_v14  ;;  %v507_v21 = vsel %vm505_vm1, %v495_v57, 2102212464  ;;  %v224_v23 = vshll.u32 %v2840_v18, 30  ;;  %v511_v24 = vsel %vm505_vm1, %v498_v17, 920167782 }
 0x106   :  { %v514_v25 = vsel %vm502_vm0, %v492_v12, %v495_v57  ;;  %v506_v30 = vsel %vm502_vm0, %v486_v15, %v489_v6  ;;  %v512_v33 = vsel %vm504_vm3, %v495_v57, %v511_v24  ;;  %v515_v34 = vsel %vm505_vm1, %v501_v19, 1326507024 }
 0x107   :  { %v2221_v27 = vadd.s32 4294967294, %v332_v20  ;;  %v225_v35 = vsub.s32 %v221_v58, %v224_v23  ;;  %v508_v38 = vsel %vm504_vm3, %v492_v12, %v507_v21  ;;  %v513_v39 = vsel %vm503_vm2, %v510_v22, %v512_v33 }
 0x108   :  { %v516_v41 = vsel %vm504_vm3, %v498_v17, %v515_v34  ;;  %v2846_v4 = vmul.u32.u64.low %v2816_v44, %v513_v39  ;;  %v2847_v47 = vmul.u32.u64.high %v2816_v44, %v513_v39, %v2846_v4  ;;  %v509_v61 = vsel %vm503_vm2, %v506_v30, %v508_v38 }
 0x109   :  { %vm2222_vm4 = vcmp.lt.s32.totalorder %v2221_v27, 0  ;;  %v517_v46 = vsel %vm503_vm2, %v514_v25, %v516_v41  ;;  %v227_v52 = vsub.s32 0, %v225_v35  ;;  %v377_v58 = vadd.s32 1, %v2223_v60 }
 0x10a   :  { %v335_v48 = vsel %vm2222_vm4, 0, %v2221_v27  ;;  %v2851_v50 = vmul.u32.u64.low %v2816_v44, %v517_v46  ;;  %v2852_v51 = vmul.u32.u64.high %v2816_v44, %v517_v46, %v2851_v50  ;;  %v375_v55 = vor.u32 8388608, %v2809_v43 }
 0x10b   :  { %v336_v53 = vsub.s32 32, %v335_v48  ;;  %v340_v56 = vsub.s32 4294967266, %v335_v48  ;;  %v337_v63 = vshll.u32 %v2826_v62, %v335_v48  ;;  %v2216_v1 = vmin.u32 %v227_v52, %v225_v35 }
 0x10c   :  { %v528_v8 = vadd.s32 1, %v2847_v47  ;;  %vm378_vm5 = vcmp.gt.s32.totalorder %v377_v58, 0  ;;  %v525_v11 = vmul.u32 %v2816_v44, %v509_v61  ;;  %vm527_vm6 = vc.u32 %v2852_v51, %v2846_v4 }
 0x10d   :  { %v338_v3 = vshrl.u32 %v2812_v59, %v336_v53  ;;  %v341_v6 = vadd.s32 127, %v340_v56  ;;  %v229_v10 = vclz %v2216_v1  ;;  %v379_v49 = vsel %vm378_vm5, %v377_v58, 0 }
 0x10e   :  { %v529_v62 = vsel %vm527_vm6, %v528_v8, %v2847_v47  ;;  %v381_v43 = vand.u32 31, %v379_v49  ;;  %v217_v59 = vadd.s32 %v2791_v31, %v2799_v36  ;;  %v2865_v17 = vshll.u32 %v375_v55, 8 }
 0x10f   :  { %v339_v12 = vor.u32 %v338_v3, %v337_v63  ;;  %v342_v57 = vshll.u32 %v341_v6, 23  ;;  %v2217_v13 = vadd.s32 4294967294, %v229_v10  ;;  %v530_v14 = vadd.s32 %v529_v62, %v525_v11 }
 0x110   :  { %v382_v44 = vsub.s32 32, %v381_v43  ;;  %v247_v19 = vsub.s32 4, %v2840_v18  ;;  %v2868_v22 = vshrl.u32 %v379_v49, 5  ;;  %v384_v23 = vshll.u32 %v2583_v0, %v381_v43 }
 0x111   :  { %v343_v15 = vor.u32 4788187, %v342_v57  ;;  %vm2218_vm7 = vcmp.lt.s32.totalorder %v2217_v13, 0  ;;  %v531_v60 = vadd.s32 536870912, %v530_v14  ;;  %v346_v20 = vcvt.s32.f32 %v339_v12 }
 0x112   :  { %v232_v21 = vsel %vm2218_vm7, 0, %v2217_v13  ;;  %v385_v31 = vshrl.u32 %v2584_v2, %v382_v44  ;;  %v387_v36 = vshll.u32 %v2584_v2, %v381_v43  ;;  %v388_v34 = vshrl.u32 %v4043_v5, %v382_v44 }
 0x113   :  { %v344_v24 = vand.u32 2147483647, %v343_v15  ;;  %v233_v25 = vsub.s32 32, %v232_v21  ;;  %v237_v27 = vsub.s32 4294967266, %v232_v21  ;;  %v2871_v30 = vshrl.u32 %v531_v60, 30 }
 0x114   :  { %v234_v33 = vshll.u32 %v225_v35, %v232_v21  ;;  %v391_v46 = vshrl.u32 %v4041_v7, %v382_v44  ;;  %v386_v47 = vor.u32 %v385_v31, %v384_v23  ;;  %v389_v48 = vor.u32 %v388_v34, %v387_v36 }
 0x115   :  { %v235_v38 = vshrl.u32 %v217_v59, %v233_v25  ;;  %v238_v39 = vadd.s32 127, %v237_v27  ;;  %v533_v41 = vshll.u32 %v2871_v30, 30  ;;  %v390_v52 = vshll.u32 %v4043_v5, %v381_v43 }
 0x116   :  { %vm399_vm8 = vcmp.lt.s32.totalorder %v2868_v22, 1  ;;  %v393_v56 = vshll.u32 %v4041_v7, %v381_v43  ;;  %vm163_vm9 = vcmp.lt.s32.totalorder %v2707_v28, 0  ;;  %v394_v58 = vshrl.u32 %v2587_v9, %v382_v44 }
 0x117   :  { %v236_v50 = vor.u32 %v235_v38, %v234_v33  ;;  %v239_v35 = vshll.u32 %v238_v39, 23  ;;  %v2880_v53 = vsub.s32 %v530_v14, %v533_v41  ;;  %v392_v61 = vor.u32 %v391_v46, %v390_v52 }
 0x118   :  { %v396_v63 = vshll.u32 %v2587_v9, %v381_v43  ;;  %v397_v1 = vshrl.u32 %v4039_v16, %v382_v44  ;;  %v347_v55 = vmul.f32 %v346_v20, %v344_v24  ;;  %v383_v8 = vshrl.u32 %v2583_v0, %v382_v44 }
 0x119   :  { %v240_v3 = vor.u32 4788187, %v239_v35  ;;  %v536_v6 = vsub.s32 0, %v2880_v53  ;;  %v243_v10 = vcvt.s32.f32 %v236_v50  ;;  %v395_v11 = vor.u32 %v394_v58, %v393_v56 }
 0x11a   :  { %v398_v49 = vor.u32 %v397_v1, %v396_v63  ;;  %vm401_vm10 = vcmp.lt.s32.totalorder %v2868_v22, 3  ;;  %vm402_vm11 = vcmp.lt.s32.totalorder %v2868_v22, 4  ;;  %v407_v62 = vsel %vm399_vm8, %v386_v47, %v389_v48 }
 0x11b   :  { %v241_v12 = vand.u32 2147483647, %v240_v3  ;;  %v2228_v57 = vmin.u32 %v536_v6, %v2880_v53  ;;  %v404_v13 = vsel %vm402_vm11, %v392_v61, 2102212464  ;;  %v408_v14 = vsel %vm402_vm11, %v395_v11, 920167782 }
 0x11c   :  { %v411_v43 = vsel %vm399_vm8, %v389_v48, %v392_v61  ;;  %v412_v15 = vsel %vm402_vm11, %v398_v49, 1326507024  ;;  %vm400_vm12 = vcmp.lt.s32.totalorder %v2868_v22, 2  ;;  %v409_v44 = vsel %vm401_vm10, %v392_v61, %v408_v14 }
 0x11d   :  { %v244_v59 = vmul.f32 %v243_v10, %v241_v12  ;;  %v538_v60 = vclz %v2228_v57  ;;  %v348_v20 = vxor.u32 2147483648, %v347_v55  ;;  %v403_v21 = vsel %vm399_vm8, %v383_v8, %v386_v47 }
 0x11e   :  { %v410_v23 = vsel %vm400_vm12, %v407_v62, %v409_v44  ;;  %v413_v24 = vsel %vm401_vm10, %v395_v11, %v412_v15  ;;  %v405_v33 = vsel %vm401_vm10, %v389_v48, %v404_v13  ;;  %vm266_vm13 = vcmp.lt.s32.totalorder %v2705_v26, 0 }
 0x11f   :  { %v245_v25 = vxor.u32 2147483648, %v244_v59  ;;  %v2229_v27 = vadd.s32 4294967294, %v538_v60  ;;  %v414_v31 = vsel %vm400_vm12, %v411_v43, %v413_v24  ;;  %vm2923_vm0 = vcmp.le.f32.partialorder %v161_v32, 0.7853982 }
 0x120   :  { %v2910_v36 = vmul.u32.u64.low %v2865_v17, %v414_v31  ;;  %v2911_v34 = vmul.u32.u64.high %v2865_v17, %v414_v31, %v2910_v36  ;;  %v2914_v38 = vmul.u32.u64.low %v2865_v17, %v410_v23  ;;  %v2915_v39 = vmul.u32.u64.high %v2865_v17, %v410_v23, %v2914_v38 }
 0x121   :  { %v246_v41 = vsel %vm163_vm9, %v245_v25, %v244_v59  ;;  %vm2230_vm15 = vcmp.lt.s32.totalorder %v2229_v27, 0  ;;  %v349_v47 = vsel %vm266_vm13, %v348_v20, %v347_v55  ;;  %v406_v52 = vsel %vm400_vm12, %v403_v21, %v405_v33 }
 0x122   :  { %v541_v48 = vsel %vm2230_vm15, 0, %v2229_v27  ;;  %v249_v50 = vsel %vm2923_vm0, %v2707_v28, %v246_v41  ;;  %vm2936_vm1 = vcmp.le.f32.partialorder %v264_v29, 0.7853982  ;;  %v350_v56 = vsub.s32 4, %v2805_v40 }
 0x123   :  { %v546_v35 = vsub.s32 4294967266, %v541_v48  ;;  %2494 = vcosq.f32 %v249_v50  ;;  %vm424_vm2 = vc.u32 %v2911_v34, %v2914_v38  ;;  %v425_v22 = vadd.s32 1, %v2915_v39 }
 0x124   :  { %v248_v61 = vsel %vm163_vm9, %v247_v19, %v2840_v18  ;;  %2496 = vsinq.f32 %v249_v50  ;;  %v542_v58 = vsub.s32 32, %v541_v48  ;;  %v422_v29 = vmul.u32 %v2865_v17, %v406_v52 }
 0x125   :  { %v547_v63 = vadd.s32 127, %v546_v35  ;;  %v352_v1 = vsel %vm2936_vm1, %v2705_v26, %v349_v47  ;;  %v526_v55 = vadd.s32 %v2846_v4, %v2852_v51  ;;  %v426_v3 = vsel %vm424_vm2, %v425_v22, %v2915_v39 }
 0x126   :  { %2498 = vcosq.f32 %v352_v1  ;;  %v427_v8 = vadd.s32 %v426_v3, %v422_v29  ;;  %v250_v18 = vsel %vm2923_vm0, 0, %v248_v61  ;;  %v351_v17 = vsel %vm266_vm13, %v350_v56, %v2805_v40 }
 0x127   :  { %v548_v6 = vshll.u32 %v547_v63, 23  ;;  %2500 = vsinq.f32 %v352_v1  ;;  %v544_v19 = vshrl.u32 %v526_v55, %v542_v58  ;;  %v254_v11 = vand.u32 3, %v250_v18 }
 0x128   :  { %v428_v10 = vadd.s32 536870912, %v427_v8  ;;  %v543_v49 = vshll.u32 %v2880_v53, %v541_v48  ;;  %v353_v51 = vsel %vm2936_vm1, 0, %v351_v17  ;;  %vm253_vm6 = vweird.f32 %v2707_v28 }
 0x129   :  { %v549_v12 = vor.u32 4788187, %v548_v6  ;;  %v357_v15 = vand.u32 3, %v353_v51  ;;  %vm259_vm3 = vcmp.eq.s32.totalorder %v254_v11, 2  ;;  %vm255_vm4 = vcmp.lt.s32.totalorder %v254_v11, 2 }
 0x12a   :  { %v2962_v4 = vshrl.u32 %v428_v10, 30  ;;  %v545_v62 = vor.u32 %v544_v19, %v543_v49  ;;  %vm256_vm5 = vcmp.eq.s32.totalorder %v254_v11, 0  ;;  %vm356_vm10 = vweird.f32 %v2705_v26 }
 0x12b   :  { %v550_v59 = vand.u32 2147483647, %v549_v12  ;;  %vm362_vm7 = vcmp.eq.s32.totalorder %v357_v15, 2  ;;  %vm359_vm8 = vcmp.eq.s32.totalorder %v357_v15, 0  ;;  %vm358_vm9 = vcmp.lt.s32.totalorder %v357_v15, 2 }
 0x12c   :  { %v430_v13 = vshll.u32 %v2962_v4, 30  ;;  %v552_v21 = vcvt.s32.f32 %v545_v62  ;;  %vm472_vm12 = vcmp.lt.s32.totalorder %v2715_v37, 0  ;;  %v423_v22 = vadd.s32 %v2914_v38, %v2911_v34 }
 0x12d   :  { %v2495_v57 = vpop.eup %2494  ;;  %vm2976_vm13 = vcmp.le.f32.partialorder %v470_v42, 0.7853982  ;;  %v556_v18 = vsub.s32 4, %v2871_v30  ;;  %vm369_vm15 = vcmp.lt.s32.totalorder %v2721_v45, 0  ;;  %vm2990_vm0 = vcmp.le.f32.partialorder %v367_v54, 0.7853982 }
 0x12e   :  { %v2497_v14 = vpop.eup %2496  ;;  %v260_v43 = vxor.u32 2147483648, %v2495_v57  ;;  %v431_v40 = vsub.s32 %v427_v8, %v430_v13  ;;  %v553_v31 = vmul.f32 %v552_v21, %v550_v59  ;;  %v453_v49 = vsub.s32 4, %v2962_v4 }
 0x12f   :  { %v257_v60 = vxor.u32 2147483648, %v2497_v14  ;;  %v557_v19 = vsel %vm472_vm12, %v556_v18, %v2871_v30 }
 0x130   :  { %v2499_v44 = vpop.eup %2498  ;;  %v261_v53 = vsel %vm259_vm3, %v260_v43, %v2497_v14  ;;  %v433_v23 = vsub.s32 0, %v431_v40  ;;  %v554_v50 = vxor.u32 2147483648, %v553_v31  ;;  %v454_v30 = vsel %vm369_vm15, %v453_v49, %v2962_v4 }
 0x131   :  { %v2501_v20 = vpop.eup %2500  ;;  %v258_v24 = vsel %vm256_vm5, %v2495_v57, %v257_v60  ;;  %v363_v25 = vxor.u32 2147483648, %v2499_v44  ;;  %v559_v57 = vsel %vm2976_vm13, 0, %v557_v19  ;;  %v456_v43 = vsel %vm2990_vm0, 0, %v454_v30 }
 0x132   :  { %v262_v27 = vsel %vm255_vm4, %v258_v24, %v261_v53  ;;  %v360_v33 = vxor.u32 2147483648, %v2501_v20  ;;  %v2224_v36 = vmin.u32 %v433_v23, %v431_v40  ;;  %v555_v56 = vsel %vm472_vm12, %v554_v50, %v553_v31  ;;  %v574_v31 = vld [vmem:[%s4031_s3 + $0x8] sm:$0xff] }
 0x133   :  { %v364_v39 = vsel %vm362_vm7, %v363_v25, %v2501_v20  ;;  %v263_v41 = vsel %vm253_vm6, nan, %v262_v27  ;;  %v558_v55 = vsel %vm2976_vm13, %v2715_v37, %v555_v56  ;;  %v563_v54 = vand.u32 3, %v559_v57 }
 0x134   :  { %v361_v46 = vsel %vm359_vm8, %v2499_v44, %v360_v33  ;;  %v435_v47 = vclz %v2224_v36  ;;  %2502 = vcosq.f32 %v558_v55  ;;  %v460_v15 = vand.u32 3, %v456_v43  ;;  %v575_v36 = vld [vmem:[%s4031_s3 + $0x10] sm:$0xff] }
 0x135   :  { %v365_v48 = vsel %vm358_vm9, %v361_v46, %v364_v39  ;;  %2504 = vsinq.f32 %v558_v55  ;;  %vm565_vm1 = vcmp.eq.s32.totalorder %v563_v54, 0  ;;  %vm568_vm2 = vcmp.eq.s32.totalorder %v563_v54, 2  ;;  %v578_v39 = vld [vmem:[%s4031_s3 + $0x28] sm:$0xff]  ;;  %v580_v46 = vld [vmem:[%s4031_s3 + $0x38] sm:$0xff] }
 0x136   :  { %v366_v52 = vsel %vm356_vm10, nan, %v365_v48  ;;  %v2225_v35 = vadd.s32 4294967294, %v435_v47  ;;  %vm564_vm3 = vcmp.lt.s32.totalorder %v563_v54, 2  ;;  %vm465_vm4 = vcmp.eq.s32.totalorder %v460_v15, 2  ;;  %v597_v47 = vpop.permute.xlu1 %596 }
 0x137   :  { %v2387_v32 = vpack.c.bf16 %v366_v52, %v263_v41  ;;  %vm462_vm5 = vcmp.eq.s32.totalorder %v460_v15, 0  ;;  %vm562_vm6 = vweird.f32 %v2715_v37  ;;  %vm461_vm7 = vcmp.lt.s32.totalorder %v460_v15, 2  ;;  %v576_v37 = vld [vmem:[%s4031_s3 + $0x18] sm:$0xff]  ;;  %v579_v41 = vld [vmem:[%s4031_s3 + $0x30] sm:$0xff]  ;;  %v592_v52 = vpop.permute.xlu0 %591 }
 0x138   :  { %vm2226_vm11 = vcmp.lt.s32.totalorder %v2225_v35, 0  ;;  %vm459_vm8 = vweird.f32 %v2721_v45 }
 0x139   :  { %2388 = vmatprep.subr.bf16.mxu1 %v2387_v32  ;;  %v438_v28 = vsel %vm2226_vm11, 0, %v2225_v35 }
 0x13a   :  { %2390 = vmatpush3.bf16.msra.mxu1 %v2387_v32  ;;  %v439_v61 = vsub.s32 32, %v438_v28  ;;  %v443_v58 = vsub.s32 4294967266, %v438_v28  ;;  %v440_v63 = vshll.u32 %v431_v40, %v438_v28 }
 0x13c   :  { %v441_v29 = vshrl.u32 %v423_v22, %v439_v61  ;;  %v444_v1 = vadd.s32 127, %v443_v58  ;;  %v607_v22 = vpop.permute.xlu1 %606 }
 0x13e   :  { %v442_v3 = vor.u32 %v441_v29, %v440_v63  ;;  %v445_v6 = vshll.u32 %v444_v1, 23  ;;  %v2503_v51 = vpop.eup %2502 }
 0x13f   :  { %v2505_v62 = vpop.eup %2504  ;;  %v569_v14 = vxor.u32 2147483648, %v2503_v51 }
 0x140   :  { %v446_v8 = vor.u32 4788187, %v445_v6  ;;  %v449_v38 = vcvt.s32.f32 %v442_v3  ;;  %v566_v13 = vxor.u32 2147483648, %v2505_v62 }
 0x141   :  { %v570_v40 = vsel %vm568_vm2, %v569_v14, %v2505_v62 }
 0x142   :  { %v447_v34 = vand.u32 2147483647, %v446_v8  ;;  %v567_v59 = vsel %vm565_vm1, %v2503_v51, %v566_v13  ;;  %v602_v8 = vpop.permute.xlu0 %601 }
 0x143   :  { %v571_v20 = vsel %vm564_vm3, %v567_v59, %v570_v40 }
 0x144   :  { %v450_v42 = vmul.f32 %v449_v38, %v447_v34  ;;  %v572_v24 = vsel %vm562_vm6, nan, %v571_v20 }
 0x146   :  { %v451_v17 = vxor.u32 2147483648, %v450_v42 }
 0x148   :  { %v452_v11 = vsel %vm369_vm15, %v451_v17, %v450_v42 }
 0x149   :  { %v455_v12 = vsel %vm2990_vm0, %v2721_v45, %v452_v11  ;;  %v577_v45 = vld [vmem:[%s4031_s3 + $0x20] sm:$0xff] }
 0x14a   :  { %2506 = vcosq.f32 %v455_v12 }
 0x14b   :  { %2508 = vsinq.f32 %v455_v12 }
 0x154   :  { %v2507_v60 = vpop.eup %2506 }
 0x155   :  { %v2509_v44 = vpop.eup %2508  ;;  %v466_v53 = vxor.u32 2147483648, %v2507_v60 }
 0x156   :  { %v463_v21 = vxor.u32 2147483648, %v2509_v44 }
 0x157   :  { %v467_v4 = vsel %vm465_vm4, %v466_v53, %v2509_v44 }
 0x158   :  { %v464_v23 = vsel %vm462_vm5, %v2507_v60, %v463_v21 }
 0x159   :  { %v468_v25 = vsel %vm461_vm7, %v464_v23, %v467_v4 }
 0x15a   :  { %v469_v27 = vsel %vm459_vm8, nan, %v468_v25 }
 0x15b   :  { %v2391_v33 = vpack.c.bf16 %v572_v24, %v469_v27 }
 0x15d   :  { %2392 = vmatprep.subr.bf16.mxu1 %v2391_v33 }
 0x15e   :  { %2394 = vmatpush3.bf16.msra.mxu1 %v2391_v33 }
 0x161   :  { %2343 = vmatmul.mubr.msk.f32.vlgmr.msra.gmra.mrb[0].mxu1 %vm629_vm14, %v574_v31 }
 0x162   :  { %2345 = vmatprep.mubr.msk.f32.mxu1 %vm629_vm14, %v575_v36 }
 0x165   :  { %2346 = vmatmul.mubr.msk.f32.gmra.mrb[2].mxu1 %vm629_vm14, %v576_v37 }
 0x166   :  { %2348 = vmatprep.mubr.msk.f32.mxu1 %vm629_vm14, %v577_v45 }
 0x169   :  { %2349 = vmatmul.mubr.msk.f32.gmra.mrb[4].mxu1 %vm629_vm14, %v578_v39 }
 0x16a   :  { %2351 = vmatprep.mubr.msk.f32.mxu1 %vm629_vm14, %v579_v41 }
 0x16d   :  { %2352 = vmatmul.mubr.msk.f32.gmra.mrb[6].mxu1 %vm629_vm14, %v580_v46 }
 0x234   :  { %v2344_v48 = vpop.f32.mrb[0].mxu1 }
 0x235   :  { %v3033_v50 = vadd.f32 %v2344_v48, %v597_v47  ;;  %v720_v35 = vpop.f32.mrb[1].mxu1 }
 0x236   :  { %v3035_v32 = vadd.f32 %v720_v35, %v592_v52 }
 0x237   :  { %v862_v28 = vand.u32 2147483647, %v3033_v50  ;;  %v865_v56 = vand.u32 2139095040, %v3033_v50 }
 0x238   :  { %v759_v61 = vand.u32 2147483647, %v3035_v32  ;;  %v762_v58 = vand.u32 2139095040, %v3035_v32  ;;  %v2347_v26 = vpop.f32.mrb[2].mxu1 }
 0x239   :  { %v866_v63 = vshrl.u32 %v865_v56, 23  ;;  %v869_v29 = vand.u32 8388607, %v862_v28  ;;  %v3043_v1 = vadd.f32 %v2347_v26, %v607_v22  ;;  %v730_v55 = vpop.f32.mrb[3].mxu1 }
 0x23a   :  { %v763_v3 = vshrl.u32 %v762_v58, 23  ;;  %v766_v6 = vand.u32 8388607, %v759_v61  ;;  %v3049_v17 = vadd.f32 %v730_v55, %v602_v8 }
 0x23b   :  { %v2243_v34 = vadd.s32 4294967169, %v866_v63  ;;  %v1068_v38 = vand.u32 2147483647, %v3043_v1  ;;  %v1071_v42 = vand.u32 2139095040, %v3043_v1  ;;  %v870_v10 = vor.u32 8388608, %v869_v29 }
 0x23c   :  { %v2239_v18 = vadd.s32 4294967169, %v763_v3  ;;  %v3051_v19 = vpop.f32.mrb[4].mxu1  ;;  %v767_v49 = vor.u32 8388608, %v766_v6  ;;  %v965_v13 = vand.u32 2147483647, %v3049_v17 }
 0x23d   :  { %v872_v11 = vadd.s32 1, %v2243_v34  ;;  %v1072_v51 = vshrl.u32 %v1071_v42, 23  ;;  %v3055_v57 = vand.u32 8388607, %v1068_v38  ;;  %v3057_v62 = vpop.f32.mrb[5].mxu1  ;;  %v3062_v59 = vshll.u32 %v870_v10, 8 }
 0x23e   :  { %v769_v12 = vadd.s32 1, %v2239_v18  ;;  %v3068_v20 = vshll.u32 %v767_v49, 8 }
 0x23f   :  { %vm873_vm9 = vcmp.gt.s32.totalorder %v872_v11, 0  ;;  %v2251_v54 = vadd.s32 4294967169, %v1072_v51  ;;  %v1076_v21 = vor.u32 8388608, %v3055_v57 }
 0x240   :  { %v874_v30 = vsel %vm873_vm9, %v872_v11, 0  ;;  %vm770_vm10 = vcmp.gt.s32.totalorder %v769_v12, 0  ;;  %v3060_v14 = vpop.f32.mrb[6].mxu1 }
 0x241   :  { %v875_v43 = vshrl.u32 %v874_v30, 5  ;;  %v876_v15 = vand.u32 31, %v874_v30  ;;  %v771_v40 = vsel %vm770_vm10, %v769_v12, 0  ;;  %v3064_v60 = vpop.f32.mrb[7].mxu1  ;;  %v3073_v25 = vadd.s32 1, %v2251_v54 }
 0x242   :  { %v3066_v44 = vshrl.u32 %v771_v40, 5  ;;  %v773_v53 = vand.u32 31, %v771_v40 }
 0x243   :  { %v877_v4 = vsub.s32 32, %v876_v15  ;;  %v879_v23 = vshll.u32 %v2583_v0, %v876_v15  ;;  %v882_v24 = vshll.u32 %v2584_v2, %v876_v15  ;;  %v885_v27 = vshll.u32 %v4043_v5, %v876_v15 }
 0x244   :  { %v888_v33 = vshll.u32 %v4041_v7, %v876_v15  ;;  %v891_v31 = vshll.u32 %v2587_v9, %v876_v15  ;;  %vm894_vm11 = vcmp.lt.s32.totalorder %v875_v43, 1  ;;  %vm895_vm12 = vcmp.lt.s32.totalorder %v875_v43, 2 }
 0x245   :  { %v880_v36 = vshrl.u32 %v2584_v2, %v877_v4  ;;  %v883_v37 = vshrl.u32 %v4043_v5, %v877_v4  ;;  %v886_v45 = vshrl.u32 %v4041_v7, %v877_v4  ;;  %v878_v39 = vshrl.u32 %v2583_v0, %v877_v4 }
 0x246   :  { %v889_v41 = vshrl.u32 %v2587_v9, %v877_v4  ;;  %v892_v46 = vshrl.u32 %v4039_v16, %v877_v4  ;;  %vm896_vm13 = vcmp.lt.s32.totalorder %v875_v43, 3  ;;  %v774_v35 = vsub.s32 32, %v773_v53 }
 0x247   :  { %v881_v47 = vor.u32 %v880_v36, %v879_v23  ;;  %v884_v48 = vor.u32 %v883_v37, %v882_v24  ;;  %v887_v52 = vor.u32 %v886_v45, %v885_v27  ;;  %vm897_vm15 = vcmp.lt.s32.totalorder %v875_v43, 4 }
 0x248   :  { %v890_v56 = vor.u32 %v889_v41, %v888_v33  ;;  %v893_v22 = vor.u32 %v892_v46, %v891_v31  ;;  %v776_v58 = vshll.u32 %v2583_v0, %v773_v53  ;;  %v779_v34 = vshll.u32 %v2584_v2, %v773_v53 }
 0x249   :  { %v898_v26 = vsel %vm894_vm11, %v878_v39, %v881_v47  ;;  %v899_v63 = vsel %vm897_vm15, %v887_v52, 2102212464  ;;  %v902_v29 = vsel %vm894_vm11, %v881_v47, %v884_v48  ;;  %v906_v55 = vsel %vm894_vm11, %v884_v48, %v887_v52 }
 0x24a   :  { %v900_v3 = vsel %vm896_vm13, %v884_v48, %v899_v63  ;;  %v903_v6 = vsel %vm897_vm15, %v890_v56, 920167782  ;;  %v907_v8 = vsel %vm897_vm15, %v893_v22, 1326507024  ;;  %v775_v10 = vshrl.u32 %v2583_v0, %v774_v35 }
 0x24b   :  { %v904_v18 = vsel %vm896_vm13, %v887_v52, %v903_v6  ;;  %v908_v42 = vsel %vm896_vm13, %v890_v56, %v907_v8  ;;  %v777_v11 = vshrl.u32 %v2584_v2, %v774_v35  ;;  %v901_v49 = vsel %vm895_vm12, %v898_v26, %v900_v3 }
 0x24c   :  { %v905_v12 = vsel %vm895_vm12, %v902_v29, %v904_v18  ;;  %v909_v51 = vsel %vm895_vm12, %v906_v55, %v908_v42  ;;  %v780_v30 = vshrl.u32 %v4043_v5, %v774_v35  ;;  %v782_v27 = vshll.u32 %v4043_v5, %v773_v53 }
 0x24d   :  { %v3099_v54 = vmul.u32.u64.low %v3062_v59, %v909_v51  ;;  %v3100_v15 = vmul.u32.u64.high %v3062_v59, %v909_v51, %v3099_v54  ;;  %v3103_v40 = vmul.u32.u64.low %v3062_v59, %v905_v12  ;;  %v3104_v4 = vmul.u32.u64.high %v3062_v59, %v905_v12, %v3103_v40 }
 0x24e   :  { %v778_v23 = vor.u32 %v777_v11, %v776_v58  ;;  %v781_v24 = vor.u32 %v780_v30, %v779_v34  ;;  %v783_v33 = vshrl.u32 %v4041_v7, %v774_v35  ;;  %v917_v31 = vmul.u32 %v3062_v59, %v901_v49 }
 0x24f   :  { %v785_v43 = vshll.u32 %v4041_v7, %v773_v53  ;;  %v786_v36 = vshrl.u32 %v2587_v9, %v774_v35  ;;  %v789_v37 = vshrl.u32 %v4039_v16, %v774_v35  ;;  %v788_v39 = vshll.u32 %v2587_v9, %v773_v53 }
 0x250   :  { %v784_v45 = vor.u32 %v783_v33, %v782_v27  ;;  %vm791_vm0 = vcmp.lt.s32.totalorder %v3066_v44, 1  ;;  %vm792_vm1 = vcmp.lt.s32.totalorder %v3066_v44, 2  ;;  %vm919_vm2 = vc.u32 %v3100_v15, %v3103_v40 }
 0x251   :  { %v920_v41 = vadd.s32 1, %v3104_v4  ;;  %v787_v46 = vor.u32 %v786_v36, %v785_v43  ;;  %vm793_vm3 = vcmp.lt.s32.totalorder %v3066_v44, 3  ;;  %v790_v59 = vor.u32 %v789_v37, %v788_v39 }
 0x252   :  { %vm794_vm4 = vcmp.lt.s32.totalorder %v3066_v44, 4  ;;  %v795_v47 = vsel %vm791_vm0, %v775_v10, %v778_v23  ;;  %v799_v48 = vsel %vm791_vm0, %v778_v23, %v781_v24  ;;  %v803_v56 = vsel %vm791_vm0, %v781_v24, %v784_v45 }
 0x253   :  { %v921_v52 = vsel %vm919_vm2, %v920_v41, %v3104_v4  ;;  %v796_v35 = vsel %vm794_vm4, %v784_v45, 2102212464  ;;  %v800_v53 = vsel %vm794_vm4, %v787_v46, 920167782  ;;  %v804_v63 = vsel %vm794_vm4, %v790_v59, 1326507024 }
 0x254   :  { %v922_v22 = vadd.s32 %v921_v52, %v917_v31  ;;  %v797_v58 = vsel %vm793_vm3, %v781_v24, %v796_v35  ;;  %v801_v26 = vsel %vm793_vm3, %v784_v45, %v800_v53  ;;  %v805_v55 = vsel %vm793_vm3, %v787_v46, %v804_v63 }
 0x255   :  { %v802_v29 = vsel %vm792_vm1, %v799_v48, %v801_v26  ;;  %vm1079_vm5 = vcmp.gt.s32.totalorder %v3073_v25, 0  ;;  %v968_v3 = vand.u32 2139095040, %v3049_v17  ;;  %v806_v8 = vsel %vm792_vm1, %v803_v56, %v805_v55 }
 0x256   :  { %v923_v6 = vadd.s32 536870912, %v922_v22  ;;  %v3127_v34 = vmul.u32.u64.low %v3068_v20, %v802_v29  ;;  %v3128_v18 = vmul.u32.u64.high %v3068_v20, %v802_v29, %v3127_v34  ;;  %v798_v42 = vsel %vm792_vm1, %v795_v47, %v797_v58 }
 0x257   :  { %v3134_v10 = vmul.u32.u64.low %v3068_v20, %v806_v8  ;;  %v3135_v11 = vmul.u32.u64.high %v3068_v20, %v806_v8, %v3134_v10  ;;  %v1080_v49 = vsel %vm1079_vm5, %v3073_v25, 0  ;;  %v3141_v30 = vadd.s32 %v3103_v40, %v3100_v15 }
 0x258   :  { %v3138_v12 = vshrl.u32 %v923_v6, 30  ;;  %v1082_v51 = vand.u32 31, %v1080_v49  ;;  %v3145_v54 = vshll.u32 %v1076_v21, 8  ;;  %v969_v4 = vshrl.u32 %v968_v3, 23 }
 0x259   :  { %v3149_v44 = vand.u32 8388607, %v965_v13  ;;  %v814_v24 = vmul.u32 %v3068_v20, %v798_v42  ;;  %v817_v25 = vadd.s32 1, %v3128_v18  ;;  %vm816_vm6 = vc.u32 %v3135_v11, %v3127_v34 }
 0x25a   :  { %v925_v23 = vshll.u32 %v3138_v12, 30  ;;  %v1083_v27 = vsub.s32 32, %v1082_v51  ;;  %v1081_v15 = vshrl.u32 %v1080_v49, 5  ;;  %v1085_v57 = vshll.u32 %v2583_v0, %v1082_v51 }
 0x25b   :  { %v1088_v21 = vshll.u32 %v2584_v2, %v1082_v51  ;;  %v818_v33 = vsel %vm816_vm6, %v817_v25, %v3128_v18  ;;  %v1091_v43 = vshll.u32 %v4043_v5, %v1082_v51  ;;  %v1094_v45 = vshll.u32 %v4041_v7, %v1082_v51 }
 0x25c   :  { %v3158_v40 = vsub.s32 %v922_v22, %v925_v23  ;;  %v1086_v31 = vshrl.u32 %v2584_v2, %v1083_v27  ;;  %v819_v20 = vadd.s32 %v818_v33, %v814_v24  ;;  %v1089_v36 = vshrl.u32 %v4043_v5, %v1083_v27 }
 0x25d   :  { %v1092_v37 = vshrl.u32 %v4041_v7, %v1083_v27  ;;  %v1095_v46 = vshrl.u32 %v2587_v9, %v1083_v27  ;;  %v1097_v59 = vshll.u32 %v2587_v9, %v1082_v51  ;;  %v1098_v35 = vshrl.u32 %v4039_v16, %v1083_v27 }
 0x25e   :  { %v928_v39 = vsub.s32 0, %v3158_v40  ;;  %v1087_v41 = vor.u32 %v1086_v31, %v1085_v57  ;;  %v820_v47 = vadd.s32 536870912, %v819_v20  ;;  %v1090_v48 = vor.u32 %v1089_v36, %v1088_v21 }
 0x25f   :  { %v1093_v52 = vor.u32 %v1092_v37, %v1091_v43  ;;  %v1084_v56 = vshrl.u32 %v2583_v0, %v1083_v27  ;;  %v1096_v22 = vor.u32 %v1095_v46, %v1094_v45  ;;  %v2247_v58 = vadd.s32 4294967169, %v969_v4 }
 0x260   :  { %v2244_v53 = vmin.u32 %v928_v39, %v3158_v40  ;;  %v3172_v26 = vshrl.u32 %v820_v47, 30  ;;  %v1099_v63 = vor.u32 %v1098_v35, %v1097_v59  ;;  %vm1100_vm7 = vcmp.lt.s32.totalorder %v1081_v15, 1 }
 0x261   :  { %vm1103_vm8 = vcmp.lt.s32.totalorder %v1081_v15, 4  ;;  %vm1101_vm9 = vcmp.lt.s32.totalorder %v1081_v15, 2  ;;  %v1108_v3 = vsel %vm1100_vm7, %v1087_v41, %v1090_v48  ;;  %vm1102_vm10 = vcmp.lt.s32.totalorder %v1081_v15, 3 }
 0x262   :  { %v930_v29 = vclz %v2244_v53  ;;  %v1105_v55 = vsel %vm1103_vm8, %v1093_v52, 2102212464  ;;  %v822_v6 = vshll.u32 %v3172_v26, 30  ;;  %v1109_v8 = vsel %vm1103_vm8, %v1096_v22, 920167782 }
 0x263   :  { %v1112_v18 = vsel %vm1100_vm7, %v1090_v48, %v1093_v52  ;;  %v1104_v10 = vsel %vm1100_vm7, %v1084_v56, %v1087_v41  ;;  %v1110_v49 = vsel %vm1102_vm10, %v1093_v52, %v1109_v8  ;;  %v1113_v51 = vsel %vm1103_vm8, %v1099_v63, 1326507024 }
 0x264   :  { %v2245_v42 = vadd.s32 4294967294, %v930_v29  ;;  %v3175_v23 = vsub.s32 %v819_v20, %v822_v6  ;;  %v1106_v4 = vsel %vm1102_vm10, %v1090_v48, %v1105_v55  ;;  %v1111_v24 = vsel %vm1101_vm9, %v1108_v3, %v1110_v49  ;;  %v617_v20 = vpop.permute.xlu1 %616 }
 0x265   :  { %v1114_v25 = vsel %vm1102_vm10, %v1096_v22, %v1113_v51  ;;  %v3180_v57 = vmul.u32.u64.low %v3145_v54, %v1111_v24  ;;  %v3181_v21 = vmul.u32.u64.high %v3145_v54, %v1111_v24, %v3180_v57  ;;  %v1107_v39 = vsel %vm1101_vm9, %v1104_v10, %v1106_v4 }
 0x266   :  { %vm2246_vm11 = vcmp.lt.s32.totalorder %v2245_v42, 0  ;;  %v1115_v27 = vsel %vm1101_vm9, %v1112_v18, %v1114_v25  ;;  %v825_v31 = vsub.s32 0, %v3175_v23  ;;  %v975_v41 = vadd.s32 1, %v2247_v58 }
 0x267   :  { %v933_v33 = vsel %vm2246_vm11, 0, %v2245_v42  ;;  %v3186_v43 = vmul.u32.u64.low %v3145_v54, %v1115_v27  ;;  %v3187_v36 = vmul.u32.u64.high %v3145_v54, %v1115_v27, %v3186_v43  ;;  %v973_v47 = vor.u32 8388608, %v3149_v44 }
 0x268   :  { %v934_v37 = vsub.s32 32, %v933_v33  ;;  %v938_v45 = vsub.s32 4294967266, %v933_v33  ;;  %v935_v46 = vshll.u32 %v3158_v40, %v933_v33  ;;  %v2240_v59 = vmin.u32 %v825_v31, %v3175_v23 }
 0x269   :  { %v3194_v48 = vadd.f32 %v3051_v19, %v617_v20  ;;  %v1126_v53 = vadd.s32 1, %v3181_v21  ;;  %vm976_vm12 = vcmp.gt.s32.totalorder %v975_v41, 0  ;;  %v1123_v15 = vmul.u32 %v3145_v54, %v1107_v39 }
 0x26a   :  { %v936_v52 = vshrl.u32 %v3141_v30, %v934_v37  ;;  %v939_v35 = vadd.s32 127, %v938_v45  ;;  %v827_v56 = vclz %v2240_v59  ;;  %vm1125_vm13 = vc.u32 %v3187_v36, %v3180_v57 }
 0x26b   :  { %v977_v40 = vsel %vm976_vm12, %v975_v41, 0  ;;  %v1127_v44 = vsel %vm1125_vm13, %v1126_v53, %v3181_v21  ;;  %vm864_vm15 = vcmp.lt.s32.totalorder %v3033_v50, 0  ;;  %v815_v19 = vadd.s32 %v3127_v34, %v3135_v11 }
 0x26c   :  { %v937_v22 = vor.u32 %v936_v52, %v935_v46  ;;  %v940_v58 = vshll.u32 %v939_v35, 23  ;;  %v2241_v30 = vadd.s32 4294967294, %v827_v56  ;;  %v1128_v63 = vadd.s32 %v1127_v44, %v1123_v15 }
 0x26d   :  { %v979_v29 = vand.u32 31, %v977_v40  ;;  %vm3207_vm0 = vcmp.le.f32.partialorder %v862_v28, 0.7853982  ;;  %v3211_v3 = vshrl.u32 %v977_v40, 5  ;;  %v3213_v6 = vshll.u32 %v973_v47, 8 }
 0x26e   :  { %v941_v55 = vor.u32 4788187, %v940_v58  ;;  %v1274_v8 = vand.u32 2147483647, %v3194_v48  ;;  %v944_v18 = vcvt.s32.f32 %v937_v22  ;;  %vm2242_vm1 = vcmp.lt.s32.totalorder %v2241_v30, 0 }
 0x26f   :  { %v1129_v42 = vadd.s32 536870912, %v1128_v63  ;;  %v980_v34 = vsub.s32 32, %v979_v29  ;;  %v830_v10 = vsel %vm2242_vm1, 0, %v2241_v30  ;;  %v982_v49 = vshll.u32 %v2583_v0, %v979_v29 }
 0x270   :  { %v942_v11 = vand.u32 2147483647, %v941_v55  ;;  %v985_v28 = vshll.u32 %v2584_v2, %v979_v29  ;;  %v831_v51 = vsub.s32 32, %v830_v10  ;;  %v835_v4 = vsub.s32 4294967266, %v830_v10 }
 0x271   :  { %v3218_v24 = vshrl.u32 %v1129_v42, 30  ;;  %v988_v25 = vshll.u32 %v4043_v5, %v979_v29  ;;  %v832_v21 = vshll.u32 %v3175_v23, %v830_v10  ;;  %v983_v33 = vshrl.u32 %v2584_v2, %v980_v34 }
 0x272   :  { %v945_v27 = vmul.f32 %v944_v18, %v942_v11  ;;  %v986_v31 = vshrl.u32 %v4043_v5, %v980_v34  ;;  %v833_v43 = vshrl.u32 %v815_v19, %v831_v51  ;;  %v836_v20 = vadd.s32 127, %v835_v4 }
 0x273   :  { %v1131_v37 = vshll.u32 %v3218_v24, 30  ;;  %v989_v45 = vshrl.u32 %v4041_v7, %v980_v34  ;;  %v984_v41 = vor.u32 %v983_v33, %v982_v49  ;;  %v991_v59 = vshll.u32 %v4041_v7, %v979_v29 }
 0x274   :  { %v946_v39 = vxor.u32 2147483648, %v945_v27  ;;  %v987_v46 = vor.u32 %v986_v31, %v985_v28  ;;  %v834_v47 = vor.u32 %v833_v43, %v832_v21  ;;  %v837_v52 = vshll.u32 %v836_v20, 23 }
 0x275   :  { %v3227_v35 = vsub.s32 %v1128_v63, %v1131_v37  ;;  %v990_v23 = vor.u32 %v989_v45, %v988_v25  ;;  %v992_v56 = vshrl.u32 %v2587_v9, %v980_v34  ;;  %v994_v15 = vshll.u32 %v2587_v9, %v979_v29 }
 0x276   :  { %v947_v53 = vsel %vm864_vm15, %v946_v39, %v945_v27  ;;  %v995_v40 = vshrl.u32 %v4039_v16, %v980_v34  ;;  %v838_v58 = vor.u32 4788187, %v837_v52  ;;  %vm997_vm2 = vcmp.lt.s32.totalorder %v3211_v3, 1 }
 0x277   :  { %v950_v22 = vsel %vm3207_vm0, %v3033_v50, %v947_v53  ;;  %v1134_v44 = vsub.s32 0, %v3227_v35  ;;  %v981_v19 = vshrl.u32 %v2583_v0, %v980_v34  ;;  %v993_v30 = vor.u32 %v992_v56, %v991_v59  ;;  %v612_v56 = vpop.permute.xlu0 %611 }
 0x278   :  { %v996_v63 = vor.u32 %v995_v40, %v994_v15  ;;  %vm998_vm3 = vcmp.lt.s32.totalorder %v3211_v3, 2  ;;  %v839_v55 = vand.u32 2147483647, %v838_v58  ;;  %v841_v18 = vcvt.s32.f32 %v834_v47 }
 0x279   :  { %v2252_v29 = vmin.u32 %v1134_v44, %v3227_v35  ;;  %vm1000_vm4 = vcmp.lt.s32.totalorder %v3211_v3, 4  ;;  %vm999_vm5 = vcmp.lt.s32.totalorder %v3211_v3, 3  ;;  %v1005_v11 = vsel %vm997_vm2, %v984_v41, %v987_v46 }
 0x27a   :  { %v1002_v42 = vsel %vm1000_vm4, %v990_v23, 2102212464  ;;  %v1006_v10 = vsel %vm1000_vm4, %v993_v30, 920167782  ;;  %v842_v49 = vmul.f32 %v841_v18, %v839_v55  ;;  %v1001_v34 = vsel %vm997_vm2, %v981_v19, %v984_v41 }
 0x27b   :  { %v1136_v28 = vclz %v2252_v29  ;;  %v1007_v51 = vsel %vm999_vm5, %v990_v23, %v1006_v10  ;;  %v1003_v4 = vsel %vm999_vm5, %v987_v46, %v1002_v42  ;;  %v1009_v27 = vsel %vm997_vm2, %v987_v46, %v990_v23  ;;  %v627_v42 = vpop.permute.xlu1 %626 }
 0x27c   :  { %v1008_v25 = vsel %vm998_vm3, %v1005_v11, %v1007_v51  ;;  %v1010_v21 = vsel %vm1000_vm4, %v996_v63, 1326507024  ;;  %vm761_vm6 = vcmp.lt.s32.totalorder %v3035_v32, 0  ;;  %v843_v33 = vxor.u32 2147483648, %v842_v49 }
 0x27d   :  { %v2253_v31 = vadd.s32 4294967294, %v1136_v28  ;;  %v1011_v43 = vsel %vm999_vm5, %v993_v30, %v1010_v21  ;;  %v3256_v37 = vmul.u32.u64.low %v3213_v6, %v1008_v25  ;;  %v3257_v45 = vmul.u32.u64.high %v3213_v6, %v1008_v25, %v3256_v37 }
 0x27e   :  { %v1012_v20 = vsel %vm998_vm3, %v1009_v27, %v1011_v43  ;;  %v1277_v39 = vand.u32 2139095040, %v3194_v48  ;;  %v1004_v41 = vsel %vm998_vm3, %v1001_v34, %v1003_v4  ;;  %vm3268_vm8 = vcmp.le.f32.partialorder %v759_v61, 0.7853982 }
 0x27f   :  { %vm2254_vm7 = vcmp.lt.s32.totalorder %v2253_v31, 0  ;;  %v3263_v46 = vmul.u32.u64.low %v3213_v6, %v1012_v20  ;;  %v3264_v59 = vmul.u32.u64.high %v3213_v6, %v1012_v20, %v3263_v46  ;;  %v1281_v53 = vand.u32 8388607, %v1274_v8 }
 0x280   :  { %v1139_v52 = vsel %vm2254_vm7, 0, %v2253_v31  ;;  %v1278_v23 = vshrl.u32 %v1277_v39, 23  ;;  %v844_v3 = vsel %vm761_vm6, %v843_v33, %v842_v49  ;;  %v1124_v15 = vadd.s32 %v3180_v57, %v3187_v36 }
 0x281   :  { %v1140_v40 = vsub.s32 32, %v1139_v52  ;;  %v1144_v58 = vsub.s32 4294967266, %v1139_v52  ;;  %v1020_v44 = vmul.u32 %v3213_v6, %v1004_v41  ;;  %v1023_v61 = vadd.s32 1, %v3257_v45 }
 0x282   :  { %v2259_v19 = vadd.s32 4294967169, %v1278_v23  ;;  %v3281_v30 = vadd.f32 %v3057_v62, %v612_v56  ;;  %v1141_v63 = vshll.u32 %v3227_v35, %v1139_v52  ;;  %vm1022_vm9 = vc.u32 %v3264_v59, %v3256_v37 }
 0x283   :  { %v1142_v55 = vshrl.u32 %v1124_v15, %v1140_v40  ;;  %v1145_v18 = vadd.s32 127, %v1144_v58  ;;  %v847_v57 = vsel %vm3268_vm8, %v3035_v32, %v844_v3  ;;  %v1024_v36 = vsel %vm1022_vm9, %v1023_v61, %v3257_v45 }
 0x284   :  { %v1282_v29 = vor.u32 8388608, %v1281_v53  ;;  %v1284_v6 = vadd.s32 1, %v2259_v19  ;;  %2510 = vcosq.f32 %v950_v22  ;;  %v1025_v62 = vadd.s32 %v1024_v36, %v1020_v44 }
 0x285   :  { %v1143_v11 = vor.u32 %v1142_v55, %v1141_v63  ;;  %v1146_v10 = vshll.u32 %v1145_v18, 23  ;;  %2512 = vsinq.f32 %v950_v22  ;;  %v3290_v35 = vadd.f32 %v3060_v14, %v627_v42 }
 0x286   :  { %vm1285_vm10 = vcmp.gt.s32.totalorder %v1284_v6, 0  ;;  %2514 = vcosq.f32 %v847_v57  ;;  %v1026_v28 = vadd.s32 536870912, %v1025_v62  ;;  %vm1070_vm11 = vcmp.lt.s32.totalorder %v3043_v1, 0 }
 0x287   :  { %v1147_v49 = vor.u32 4788187, %v1146_v10  ;;  %v1286_v34 = vsel %vm1285_vm10, %v1284_v6, 0  ;;  %2516 = vsinq.f32 %v847_v57  ;;  %v3294_v51 = vadd.s32 %v3256_v37, %v3264_v59 }
 0x288   :  { %v1288_v4 = vand.u32 31, %v1286_v34  ;;  %v3296_v25 = vshll.u32 %v1282_v29, 8  ;;  %v1150_v21 = vcvt.s32.f32 %v1143_v11  ;;  %v3298_v22 = vshrl.u32 %v1026_v28, 30 }
 0x289   :  { %v1148_v27 = vand.u32 2147483647, %v1147_v49  ;;  %v1171_v14 = vand.u32 2147483647, %v3281_v30  ;;  %v1287_v33 = vshrl.u32 %v1286_v34, 5  ;;  %v1174_v20 = vand.u32 2139095040, %v3281_v30 }
 0x28a   :  { %v1289_v31 = vsub.s32 32, %v1288_v4  ;;  %v1291_v43 = vshll.u32 %v2583_v0, %v1288_v4  ;;  %vm3305_vm12 = vcmp.le.f32.partialorder %v1068_v38, 0.7853982  ;;  %v1028_v39 = vshll.u32 %v3298_v22, 30 }
 0x28b   :  { %v1151_v45 = vmul.f32 %v1150_v21, %v1148_v27  ;;  %v1294_v41 = vshll.u32 %v2584_v2, %v1288_v4  ;;  %v1297_v46 = vshll.u32 %v4043_v5, %v1288_v4  ;;  %v1300_v53 = vshll.u32 %v4041_v7, %v1288_v4 }
 0x28c   :  { %v1292_v59 = vshrl.u32 %v2584_v2, %v1289_v31  ;;  %v1295_v52 = vshrl.u32 %v4043_v5, %v1289_v31  ;;  %v1298_v23 = vshrl.u32 %v4041_v7, %v1289_v31  ;;  %v3316_v38 = vsub.s32 %v1025_v62, %v1028_v39 }
 0x28d   :  { %v1152_v56 = vxor.u32 2147483648, %v1151_v45  ;;  %v1301_v3 = vshrl.u32 %v2587_v9, %v1289_v31  ;;  %v1304_v15 = vshrl.u32 %v4039_v16, %v1289_v31  ;;  %v1303_v61 = vshll.u32 %v2587_v9, %v1288_v4 }
 0x28e   :  { %v1293_v40 = vor.u32 %v1292_v59, %v1291_v43  ;;  %v1296_v58 = vor.u32 %v1295_v52, %v1294_v41  ;;  %v1299_v44 = vor.u32 %v1298_v23, %v1297_v46  ;;  %v3321_v19 = vpop.eup %2510  ;;  %v1031_v63 = vsub.s32 0, %v3316_v38 }
 0x28f   :  { %v1302_v55 = vor.u32 %v1301_v3, %v1300_v53  ;;  %v1175_v18 = vshrl.u32 %v1174_v20, 23  ;;  %v1178_v57 = vand.u32 8388607, %v1171_v14  ;;  %v3326_v36 = vpop.eup %2512  ;;  %v1290_v29 = vshrl.u32 %v2583_v0, %v1289_v31 }
 0x290   :  { %v1305_v6 = vor.u32 %v1304_v15, %v1303_v61  ;;  %vm1306_vm13 = vcmp.lt.s32.totalorder %v1287_v33, 1  ;;  %vm1309_vm1 = vcmp.lt.s32.totalorder %v1287_v33, 4  ;;  %v3329_v42 = vpop.eup %2514  ;;  %v1153_v11 = vsel %vm1070_vm11, %v1152_v56, %v1151_v45 }
 0x291   :  { %v2248_v10 = vmin.u32 %v1031_v63, %v3316_v38  ;;  %vm1307_vm2 = vcmp.lt.s32.totalorder %v1287_v33, 2  ;;  %v1311_v62 = vsel %vm1309_vm1, %v1299_v44, 2102212464  ;;  %v3335_v49 = vpop.eup %2516  ;;  %vm1308_vm3 = vcmp.lt.s32.totalorder %v1287_v33, 3 }
 0x292   :  { %v1310_v28 = vsel %vm1306_vm13, %v1290_v29, %v1293_v40  ;;  %v1314_v34 = vsel %vm1306_vm13, %v1293_v40, %v1296_v58  ;;  %v1315_v4 = vsel %vm1309_vm1, %v1302_v55, 920167782  ;;  %v1312_v21 = vsel %vm1308_vm3, %v1296_v58, %v1311_v62 }
 0x293   :  { %v1033_v27 = vclz %v2248_v10  ;;  %v1316_v31 = vsel %vm1308_vm3, %v1299_v44, %v1315_v4  ;;  %v1318_v43 = vsel %vm1306_vm13, %v1296_v58, %v1299_v44  ;;  %v1156_v20 = vsel %vm3305_vm12, %v3043_v1, %v1153_v11  ;;  %v622_v10 = vpop.permute.xlu0 %621 }
 0x294   :  { %v1317_v45 = vsel %vm1307_vm2, %v1314_v34, %v1316_v31  ;;  %v1319_v39 = vsel %vm1309_vm1, %v1305_v6, 1326507024  ;;  %v2255_v41 = vadd.s32 4294967169, %v1175_v18  ;;  %v1313_v53 = vsel %vm1307_vm2, %v1310_v28, %v1312_v21 }
 0x295   :  { %v2249_v46 = vadd.s32 4294967294, %v1033_v27  ;;  %v1320_v59 = vsel %vm1308_vm3, %v1302_v55, %v1319_v39  ;;  %v3344_v52 = vmul.u32.u64.low %v3296_v25, %v1317_v45  ;;  %v3345_v23 = vmul.u32.u64.high %v3296_v25, %v1317_v45, %v3344_v52 }
 0x296   :  { %v1321_v56 = vsel %vm1307_vm2, %v1318_v43, %v1320_v59  ;;  %v1179_v3 = vor.u32 8388608, %v1178_v57  ;;  %v1181_v15 = vadd.s32 1, %v2255_v41  ;;  %v1483_v44 = vand.u32 2139095040, %v3290_v35 }
 0x297   :  { %vm2250_vm4 = vcmp.lt.s32.totalorder %v2249_v46, 0  ;;  %v3351_v40 = vmul.u32.u64.low %v3296_v25, %v1321_v56  ;;  %v3352_v58 = vmul.u32.u64.high %v3296_v25, %v1321_v56, %v3351_v40  ;;  %2518 = vcosq.f32 %v1156_v20 }
 0x298   :  { %v1036_v61 = vsel %vm2250_vm4, 0, %v2249_v46  ;;  %vm1182_vm5 = vcmp.gt.s32.totalorder %v1181_v15, 0  ;;  %v4038_v63 = vand.u32 2147483647, %v3290_v35  ;;  %2520 = vsinq.f32 %v1156_v20 }
 0x299   :  { %v1037_v55 = vsub.s32 32, %v1036_v61  ;;  %v1041_v18 = vsub.s32 4294967266, %v1036_v61  ;;  %v1332_v33 = vadd.s32 1, %v3345_v23  ;;  %v1329_v57 = vmul.u32 %v3296_v25, %v1313_v53 }
 0x29a   :  { %v1183_v29 = vsel %vm1182_vm5, %v1181_v15, 0  ;;  %v3358_v6 = vshll.u32 %v1179_v3, 8  ;;  %v1484_v11 = vshrl.u32 %v1483_v44, 23  ;;  %v1038_v62 = vshll.u32 %v3316_v38, %v1036_v61 }
 0x29b   :  { %v1039_v28 = vshrl.u32 %v3294_v51, %v1037_v55  ;;  %v1042_v34 = vadd.s32 127, %v1041_v18  ;;  %vm1331_vm7 = vc.u32 %v3352_v58, %v3344_v52  ;;  %v1185_v27 = vand.u32 31, %v1183_v29 }
 0x29c   :  { %v1333_v4 = vsel %vm1331_vm7, %v1332_v33, %v3345_v23  ;;  %v3367_v21 = vand.u32 8388607, %v4038_v63  ;;  %v3370_v25 = vadd.f32 %v3064_v60, %v622_v10  ;;  %v1184_v38 = vshrl.u32 %v1183_v29, 5 }
 0x29d   :  { %v1040_v31 = vor.u32 %v1039_v28, %v1038_v62  ;;  %v1043_v43 = vshll.u32 %v1042_v34, 23  ;;  %v1334_v20 = vadd.s32 %v1333_v4, %v1329_v57  ;;  %vm967_vm9 = vcmp.lt.s32.totalorder %v3049_v17, 0 }
 0x29e   :  { %v1186_v51 = vsub.s32 32, %v1185_v27  ;;  %v1188_v45 = vshll.u32 %v2583_v0, %v1185_v27  ;;  %v1191_v39 = vshll.u32 %v2584_v2, %v1185_v27  ;;  %v2267_v41 = vadd.s32 4294967169, %v1484_v11 }
 0x29f   :  { %v1044_v46 = vor.u32 4788187, %v1043_v43  ;;  %v1047_v59 = vcvt.s32.f32 %v1040_v31  ;;  %v1335_v23 = vadd.s32 536870912, %v1334_v20  ;;  %v1194_v53 = vshll.u32 %v4043_v5, %v1185_v27 }
 0x2a0   :  { %v1189_v60 = vshrl.u32 %v2584_v2, %v1186_v51  ;;  %v1192_v56 = vshrl.u32 %v4043_v5, %v1186_v51  ;;  %v1195_v3 = vshrl.u32 %v4041_v7, %v1186_v51  ;;  %v1197_v15 = vshll.u32 %v4041_v7, %v1185_v27 }
 0x2a1   :  { %vm3382_vm10 = vcmp.le.f32.partialorder %v965_v13, 0.7853982  ;;  %v1045_v44 = vand.u32 2147483647, %v1044_v46  ;;  %v3386_v61 = vshrl.u32 %v1335_v23, 30  ;;  %v1198_v55 = vshrl.u32 %v2587_v9, %v1186_v51  ;;  %v3390_v33 = vpop.eup %2518 }
 0x2a2   :  { %v1200_v18 = vshll.u32 %v2587_v9, %v1185_v27  ;;  %v1190_v57 = vor.u32 %v1189_v60, %v1188_v45  ;;  %v1193_v29 = vor.u32 %v1192_v56, %v1191_v39  ;;  %v1196_v11 = vor.u32 %v1195_v3, %v1194_v53  ;;  %v3393_v62 = vpop.eup %2520 }
 0x2a3   :  { %v1201_v10 = vshrl.u32 %v4039_v16, %v1186_v51  ;;  %v1048_v13 = vmul.f32 %v1047_v59, %v1045_v44  ;;  %v1337_v28 = vshll.u32 %v3386_v61, 30  ;;  %v1187_v34 = vshrl.u32 %v2583_v0, %v1186_v51 }
 0x2a4   :  { %v1199_v4 = vor.u32 %v1198_v55, %v1197_v15  ;;  %vm1203_vm13 = vcmp.lt.s32.totalorder %v1184_v38, 1  ;;  %vm1204_vm1 = vcmp.lt.s32.totalorder %v1184_v38, 2  ;;  %vm1206_vm2 = vcmp.lt.s32.totalorder %v1184_v38, 4 }
 0x2a5   :  { %v1202_v31 = vor.u32 %v1201_v10, %v1200_v18  ;;  %v1049_v27 = vxor.u32 2147483648, %v1048_v13  ;;  %v3397_v43 = vsub.s32 %v1334_v20, %v1337_v28  ;;  %vm1205_vm3 = vcmp.lt.s32.totalorder %v1184_v38, 3 }
 0x2a6   :  { %v1208_v45 = vsel %vm1206_vm2, %v1196_v11, 2102212464  ;;  %v1207_v39 = vsel %vm1203_vm13, %v1187_v34, %v1190_v57  ;;  %v1211_v23 = vsel %vm1203_vm13, %v1190_v57, %v1193_v29  ;;  %v1212_v53 = vsel %vm1206_vm2, %v1199_v4, 920167782 }
 0x2a7   :  { %v1209_v46 = vsel %vm1205_vm3, %v1193_v29, %v1208_v45  ;;  %v1050_v59 = vsel %vm967_vm9, %v1049_v27, %v1048_v13  ;;  %v1340_v51 = vsub.s32 0, %v3397_v43  ;;  %v1213_v60 = vsel %vm1205_vm3, %v1196_v11, %v1212_v53 }
 0x2a8   :  { %v1215_v56 = vsel %vm1203_vm13, %v1193_v29, %v1196_v11  ;;  %v1214_v3 = vsel %vm1204_vm1, %v1211_v23, %v1213_v60  ;;  %v1216_v15 = vsel %vm1206_vm2, %v1202_v31, 1326507024  ;;  %v1488_v20 = vor.u32 8388608, %v3367_v21 }
 0x2a9   :  { %v4037_v44 = vand.u32 2147483647, %v3370_v25  ;;  %v2260_v55 = vmin.u32 %v1340_v51, %v3397_v43  ;;  %v1210_v18 = vsel %vm1204_vm1, %v1207_v39, %v1209_v46  ;;  %v1217_v57 = vsel %vm1205_vm3, %v1199_v4, %v1216_v15 }
 0x2aa   :  { %v1490_v10 = vadd.s32 1, %v2267_v41  ;;  %v1053_v13 = vsel %vm3382_vm10, %v3049_v17, %v1050_v59  ;;  %v1218_v29 = vsel %vm1204_vm1, %v1215_v56, %v1217_v57  ;;  %v1330_v41 = vadd.s32 %v3344_v52, %v3352_v58 }
 0x2ab   :  { %v3415_v11 = vmul.u32.u64.low %v3358_v6, %v1214_v3  ;;  %v3416_v28 = vmul.u32.u64.high %v3358_v6, %v1214_v3, %v3415_v11  ;;  %v1342_v21 = vclz %v2260_v55  ;;  %v3425_v27 = vshll.u32 %v1488_v20, 8 }
 0x2ac   :  { %v3420_v34 = vmul.u32.u64.low %v3358_v6, %v1218_v29  ;;  %v3421_v31 = vmul.u32.u64.high %v3358_v6, %v1218_v29, %v3420_v34  ;;  %vm1491_vm4 = vcmp.gt.s32.totalorder %v1490_v10, 0  ;;  %v1380_v38 = vand.u32 2139095040, %v3370_v25 }
 0x2ad   :  { %v1492_v4 = vsel %vm1491_vm4, %v1490_v10, 0  ;;  %2522 = vcosq.f32 %v1053_v13  ;;  %v2261_v45 = vadd.s32 4294967294, %v1342_v21  ;;  %v1226_v39 = vmul.u32 %v3358_v6, %v1210_v18 }
 0x2ae   :  { %v1494_v46 = vand.u32 31, %v1492_v4  ;;  %2524 = vsinq.f32 %v1053_v13  ;;  %v1229_v23 = vadd.s32 1, %v3416_v28  ;;  %v3430_v53 = vshrl.u32 %v1492_v4, 5 }
 0x2af   :  { %v3434_v59 = vand.u32 8388607, %v4037_v44  ;;  %vm2262_vm5 = vcmp.lt.s32.totalorder %v2261_v45, 0  ;;  %vm1228_vm7 = vc.u32 %v3421_v31, %v3415_v11  ;;  %v1381_v58 = vshrl.u32 %v1380_v38, 23 }
 0x2b0   :  { %v1495_v52 = vsub.s32 32, %v1494_v46  ;;  %v1345_v51 = vsel %vm2262_vm5, 0, %v2261_v45  ;;  %v1230_v60 = vsel %vm1228_vm7, %v1229_v23, %v3416_v28  ;;  %v1497_v6 = vshll.u32 %v2583_v0, %v1494_v46 }
 0x2b1   :  { %v845_v56 = vsub.s32 4, %v3172_v26  ;;  %v1346_v3 = vsub.s32 32, %v1345_v51  ;;  %v1350_v15 = vsub.s32 4294967266, %v1345_v51  ;;  %v1231_v20 = vadd.s32 %v1230_v60, %v1226_v39 }
 0x2b2   :  { %v1500_v55 = vshll.u32 %v2584_v2, %v1494_v46  ;;  %v1347_v18 = vshll.u32 %v3397_v43, %v1345_v51  ;;  %v1498_v57 = vshrl.u32 %v2584_v2, %v1495_v52  ;;  %v1501_v10 = vshrl.u32 %v4043_v5, %v1495_v52 }
 0x2b3   :  { %v1503_v13 = vshll.u32 %v4043_v5, %v1494_v46  ;;  %v1348_v29 = vshrl.u32 %v1330_v41, %v1346_v3  ;;  %v1351_v21 = vadd.s32 127, %v1350_v15  ;;  %v1232_v28 = vadd.s32 536870912, %v1231_v20 }
 0x2b4   :  { %v1504_v34 = vshrl.u32 %v4041_v7, %v1495_v52  ;;  %v1499_v4 = vor.u32 %v1498_v57, %v1497_v6  ;;  %v1502_v38 = vor.u32 %v1501_v10, %v1500_v55  ;;  %v1506_v45 = vshll.u32 %v4041_v7, %v1494_v46 }
 0x2b5   :  { %v1507_v39 = vshrl.u32 %v2587_v9, %v1495_v52  ;;  %v1349_v23 = vor.u32 %v1348_v29, %v1347_v18  ;;  %v1352_v60 = vshll.u32 %v1351_v21, 23  ;;  %v3449_v43 = vshrl.u32 %v1232_v28, 30 }
 0x2b6   :  { %v1505_v51 = vor.u32 %v1504_v34, %v1503_v13  ;;  %vm1276_vm13 = vcmp.lt.s32.totalorder %v3194_v48, 0  ;;  %v1496_v44 = vshrl.u32 %v2583_v0, %v1495_v52  ;;  %v1509_v3 = vshll.u32 %v2587_v9, %v1494_v46 }
 0x2b7   :  { %v1508_v41 = vor.u32 %v1507_v39, %v1506_v45  ;;  %v1510_v15 = vshrl.u32 %v4039_v16, %v1495_v52  ;;  %v3455_v6 = vpop.eup %2522  ;;  %vm3459_vm1 = vcmp.le.f32.partialorder %v1274_v8, 0.7853982  ;;  %v1353_v18 = vor.u32 4788187, %v1352_v60 }
 0x2b8   :  { %v1356_v57 = vcvt.s32.f32 %v1349_v23  ;;  %v1234_v10 = vshll.u32 %v3449_v43, 30  ;;  %vm1512_vm2 = vcmp.lt.s32.totalorder %v3430_v53, 1  ;;  %v3465_v13 = vpop.eup %2524  ;;  %vm1514_vm3 = vcmp.lt.s32.totalorder %v3430_v53, 3 }
 0x2b9   :  { %v1511_v29 = vor.u32 %v1510_v15, %v1509_v3  ;;  %vm1515_vm4 = vcmp.lt.s32.totalorder %v3430_v53, 4  ;;  %v1516_v46 = vsel %vm1512_vm2, %v1496_v44, %v1499_v4  ;;  %v1354_v52 = vand.u32 2147483647, %v1353_v18 }
 0x2ba   :  { %v3469_v21 = vsub.s32 %v1231_v20, %v1234_v10  ;;  %v1517_v8 = vsel %vm1515_vm4, %v1505_v51, 2102212464  ;;  %v1520_v28 = vsel %vm1512_vm2, %v1499_v4, %v1502_v38  ;;  %v1521_v45 = vsel %vm1515_vm4, %v1508_v41, 920167782 }
 0x2bb   :  { %v1518_v34 = vsel %vm1514_vm3, %v1502_v38, %v1517_v8  ;;  %v1524_v39 = vsel %vm1512_vm2, %v1502_v38, %v1505_v51  ;;  %v1525_v23 = vsel %vm1515_vm4, %v1511_v29, 1326507024  ;;  %v1357_v60 = vmul.f32 %v1356_v57, %v1354_v52 }
 0x2bc   :  { %v1237_v63 = vsub.s32 0, %v3469_v21  ;;  %vm1513_vm5 = vcmp.lt.s32.totalorder %v3430_v53, 2  ;;  %v1522_v3 = vsel %vm1514_vm3, %v1505_v51, %v1521_v45  ;;  %v1526_v20 = vsel %vm1514_vm3, %v1508_v41, %v1525_v23 }
 0x2bd   :  { %v1519_v44 = vsel %vm1513_vm5, %v1516_v46, %v1518_v34  ;;  %v1523_v15 = vsel %vm1513_vm5, %v1520_v28, %v1522_v3  ;;  %v2263_v4 = vadd.s32 4294967169, %v1381_v58  ;;  %v1358_v18 = vxor.u32 2147483648, %v1357_v60 }
 0x2be   :  { %v2256_v10 = vmin.u32 %v1237_v63, %v3469_v21  ;;  %v1527_v8 = vsel %vm1513_vm5, %v1524_v39, %v1526_v20  ;;  %v1385_v38 = vor.u32 8388608, %v3434_v59  ;;  %v855_v41 = vxor.u32 2147483648, %v3335_v49 }
 0x2bf   :  { %v3482_v57 = vmul.u32.u64.low %v3425_v27, %v1527_v8  ;;  %v3483_v29 = vmul.u32.u64.high %v3425_v27, %v1527_v8, %v3482_v57  ;;  %v3486_v52 = vmul.u32.u64.low %v3425_v27, %v1523_v15  ;;  %v3487_v16 = vmul.u32.u64.high %v3425_v27, %v1523_v15, %v3486_v52 }
 0x2c0   :  { %v1359_v53 = vsel %vm1276_vm13, %v1358_v18, %v1357_v60  ;;  %v1239_v51 = vclz %v2256_v10  ;;  %v1387_v58 = vadd.s32 1, %v2263_v4  ;;  %v1227_v59 = vadd.s32 %v3415_v11, %v3421_v31 }
 0x2c1   :  { %v1362_v63 = vsel %vm3459_vm1, %v3194_v48, %v1359_v53  ;;  %v1535_v46 = vmul.u32 %v3425_v27, %v1519_v44  ;;  %v3504_v28 = vsel %vm761_vm6, %v845_v56, %v3172_v26  ;;  %v3506_v45 = vshll.u32 %v1385_v38, 8 }
 0x2c2   :  { %v2257_v34 = vadd.s32 4294967294, %v1239_v51  ;;  %vm1388_vm7 = vcmp.gt.s32.totalorder %v1387_v58, 0  ;;  %v858_v39 = vxor.u32 2147483648, %v3329_v42  ;;  %2526 = vcosq.f32 %v1362_v63 }
 0x2c3   :  { %vm1537_vm2 = vc.u32 %v3483_v29, %v3486_v52  ;;  %v1538_v11 = vadd.s32 1, %v3487_v16  ;;  %v948_v31 = vsub.s32 4, %v3138_v12  ;;  %2528 = vsinq.f32 %v1362_v63 }
 0x2c4   :  { %vm2258_vm3 = vcmp.lt.s32.totalorder %v2257_v34, 0  ;;  %v1389_v27 = vsel %vm1388_vm7, %v1387_v58, 0  ;;  %v848_v26 = vsel %vm3268_vm8, 0, %v3504_v28  ;;  %vm1173_vm6 = vcmp.lt.s32.totalorder %v3281_v30, 0 }
 0x2c5   :  { %v1242_v56 = vsel %vm2258_vm3, 0, %v2257_v34  ;;  %v1539_v23 = vsel %vm1537_vm2, %v1538_v11, %v3487_v16  ;;  %v1390_v60 = vshrl.u32 %v1389_v27, 5  ;;  %v1391_v3 = vand.u32 31, %v1389_v27 }
 0x2c6   :  { %v1243_v44 = vsub.s32 32, %v1242_v56  ;;  %v1244_v15 = vshll.u32 %v3469_v21, %v1242_v56  ;;  %v1247_v20 = vsub.s32 4294967266, %v1242_v56  ;;  %v1540_v4 = vadd.s32 %v1539_v23, %v1535_v46 }
 0x2c7   :  { %v1392_v18 = vsub.s32 32, %v1391_v3  ;;  %v1394_v10 = vshll.u32 %v2583_v0, %v1391_v3  ;;  %v1397_v8 = vshll.u32 %v2584_v2, %v1391_v3  ;;  %v1400_v38 = vshll.u32 %v4043_v5, %v1391_v3 }
 0x2c8   :  { %v1245_v57 = vshrl.u32 %v1227_v59, %v1243_v44  ;;  %v1248_v47 = vadd.s32 127, %v1247_v20  ;;  %v1541_v53 = vadd.s32 536870912, %v1540_v4  ;;  %v1403_v51 = vshll.u32 %v4041_v7, %v1391_v3 }
 0x2c9   :  { %v1393_v16 = vshrl.u32 %v2583_v0, %v1392_v18  ;;  %v1395_v58 = vshrl.u32 %v2584_v2, %v1392_v18  ;;  %v1398_v21 = vshrl.u32 %v4043_v5, %v1392_v18  ;;  %v1401_v63 = vshrl.u32 %v4041_v7, %v1392_v18 }
 0x2ca   :  { %v1246_v46 = vor.u32 %v1245_v57, %v1244_v15  ;;  %v1249_v28 = vshll.u32 %v1248_v47, 23  ;;  %v3526_v34 = vshrl.u32 %v1541_v53, 30  ;;  %v1404_v11 = vshrl.u32 %v2587_v9, %v1392_v18 }
 0x2cb   :  { %v1396_v59 = vor.u32 %v1395_v58, %v1394_v10  ;;  %v1399_v27 = vor.u32 %v1398_v21, %v1397_v8  ;;  %v1402_v56 = vor.u32 %v1401_v63, %v1400_v38  ;;  %v1406_v23 = vshll.u32 %v2587_v9, %v1391_v3 }
 0x2cc   :  { %vm3533_vm8 = vcmp.le.f32.partialorder %v1171_v14, 0.7853982  ;;  %v1250_v20 = vor.u32 4788187, %v1249_v28  ;;  %v1253_v15 = vcvt.s32.f32 %v1246_v46  ;;  %v1543_v57 = vshll.u32 %v3526_v34, 30  ;;  %v3538_v53 = vpop.eup %2526 }
 0x2cd   :  { %v1405_v47 = vor.u32 %v1404_v11, %v1403_v51  ;;  %v4065_v7 = vmov 1326507024   ;;  %vm1409_vm4 = vcmp.lt.s32.totalorder %v1390_v60, 1  ;;  %vm1410_vm5 = vcmp.lt.s32.totalorder %v1390_v60, 2  ;;  %v3541_v10 = vpop.eup %2528 }
 0x2ce   :  { %v1407_v5 = vshrl.u32 %v4065_v7, %v1392_v18  ;;  %vm1411_vm7 = vcmp.lt.s32.totalorder %v1390_v60, 3  ;;  %v1251_v3 = vand.u32 2147483647, %v1250_v20  ;;  %v3543_v8 = vsub.s32 %v1540_v4, %v1543_v57 }
 0x2cf   :  { %vm1412_vm2 = vcmp.lt.s32.totalorder %v1390_v60, 4  ;;  %v1413_v14 = vsel %vm1409_vm4, %v1393_v16, %v1396_v59  ;;  %v1417_v21 = vsel %vm1409_vm4, %v1396_v59, %v1399_v27  ;;  %vm851_vm3 = vweird.f32 %v3035_v32 }
 0x2d0   :  { %v1408_v38 = vor.u32 %v1407_v5, %v1406_v23  ;;  %v1414_v58 = vsel %vm1412_vm2, %v1402_v56, 2102212464  ;;  %v1418_v51 = vsel %vm1412_vm2, %v1405_v47, 920167782  ;;  %v1254_v63 = vmul.f32 %v1253_v15, %v1251_v3 }
 0x2d1   :  { %v1546_v46 = vsub.s32 0, %v3543_v8  ;;  %v1415_v18 = vsel %vm1411_vm7, %v1399_v27, %v1414_v58  ;;  %v1419_v28 = vsel %vm1411_vm7, %v1402_v56, %v1418_v51  ;;  %v1421_v11 = vsel %vm1409_vm4, %v1399_v27, %v1402_v56 }
 0x2d2   :  { %v1420_v4 = vsel %vm1410_vm5, %v1417_v21, %v1419_v28  ;;  %v1422_v20 = vsel %vm1412_vm2, %v1408_v38, 1326507024  ;;  %v852_v16 = vand.u32 3, %v848_v26  ;;  %v1255_v5 = vxor.u32 2147483648, %v1254_v63 }
 0x2d3   :  { %v2268_v23 = vmin.u32 %v1546_v46, %v3543_v8  ;;  %v1423_v59 = vsel %vm1411_vm7, %v1405_v47, %v1422_v20  ;;  %v949_v15 = vsel %vm864_vm15, %v948_v31, %v3138_v12  ;;  %v1416_v57 = vsel %vm1410_vm5, %v1413_v14, %v1415_v18 }
 0x2d4   :  { %v1424_v3 = vsel %vm1410_vm5, %v1421_v11, %v1423_v59  ;;  %v3563_v58 = vmul.u32.u64.low %v3506_v45, %v1420_v4  ;;  %v3564_v27 = vmul.u32.u64.high %v3506_v45, %v1420_v4, %v3563_v58  ;;  %v1256_v26 = vsel %vm1173_vm6, %v1255_v5, %v1254_v63 }
 0x2d5   :  { %v1548_v56 = vclz %v2268_v23  ;;  %v3570_v47 = vmul.u32.u64.low %v3506_v45, %v1424_v3  ;;  %v3571_v38 = vmul.u32.u64.high %v3506_v45, %v1424_v3, %v3570_v47  ;;  %v1259_v12 = vsel %vm3533_vm8, %v3281_v30, %v1256_v26 }
 0x2d6   :  { %vm854_vm15 = vcmp.eq.s32.totalorder %v852_v16, 0  ;;  %vm857_vm4 = vcmp.eq.s32.totalorder %v852_v16, 2  ;;  %v951_v31 = vsel %vm3207_vm0, 0, %v949_v15  ;;  %vm853_vm5 = vcmp.lt.s32.totalorder %v852_v16, 2 }
 0x2d7   :  { %v2269_v60 = vadd.s32 4294967294, %v1548_v56  ;;  %v856_v14 = vsel %vm854_vm15, %v3329_v42, %v855_v41  ;;  %v859_v21 = vsel %vm857_vm4, %v858_v39, %v3335_v49  ;;  %vm954_vm7 = vweird.f32 %v3033_v50 }
 0x2d8   :  { %v1536_v51 = vadd.s32 %v3486_v52, %v3483_v29  ;;  %v1435_v63 = vadd.s32 1, %v3564_v27  ;;  %v860_v46 = vsel %vm853_vm5, %v856_v14, %v859_v21  ;;  %v955_v54 = vand.u32 3, %v951_v31 }
 0x2d9   :  { %2530 = vcosq.f32 %v1259_v12  ;;  %vm2270_vm0 = vcmp.lt.s32.totalorder %v2269_v60, 0  ;;  %v1432_v18 = vmul.u32 %v3506_v45, %v1416_v57  ;;  %vm1434_vm2 = vc.u32 %v3571_v38, %v3563_v58 }
 0x2da   :  { %2532 = vsinq.f32 %v1259_v12  ;;  %v1551_v41 = vsel %vm2270_vm0, 0, %v2269_v60  ;;  %v1436_v42 = vsel %vm1434_vm2, %v1435_v63, %v3564_v27  ;;  %v861_v49 = vsel %vm851_vm3, nan, %v860_v46 }
 0x2db   :  { %v1552_v39 = vsub.s32 32, %v1551_v41  ;;  %v1556_v29 = vsub.s32 4294967266, %v1551_v41  ;;  %v1437_v52 = vadd.s32 %v1436_v42, %v1432_v18  ;;  %vm957_vm15 = vcmp.eq.s32.totalorder %v955_v54, 0 }
 0x2dc   :  { %v1553_v28 = vshll.u32 %v3543_v8, %v1551_v41  ;;  %v958_v4 = vxor.u32 2147483648, %v3326_v36  ;;  %v961_v45 = vxor.u32 2147483648, %v3321_v19  ;;  %v1051_v11 = vsub.s32 4, %v3298_v22 }
 0x2dd   :  { %v1554_v20 = vshrl.u32 %v1536_v51, %v1552_v39  ;;  %v1557_v16 = vadd.s32 127, %v1556_v29  ;;  %v1438_v5 = vadd.s32 536870912, %v1437_v52  ;;  %vm960_vm4 = vcmp.eq.s32.totalorder %v955_v54, 2 }
 0x2de   :  { %vm956_vm5 = vcmp.lt.s32.totalorder %v955_v54, 2  ;;  %v959_v32 = vsel %vm957_vm15, %v3321_v19, %v958_v4  ;;  %v962_v23 = vsel %vm960_vm4, %v961_v45, %v3326_v36  ;;  %v1052_v59 = vsel %vm967_vm9, %v1051_v11, %v3298_v22 }
 0x2df   :  { %v1555_v8 = vor.u32 %v1554_v20, %v1553_v28  ;;  %v1558_v15 = vshll.u32 %v1557_v16, 23  ;;  %v3603_v57 = vshrl.u32 %v1438_v5, 30  ;;  %v963_v3 = vsel %vm956_vm5, %v959_v32, %v962_v23 }
 0x2e0   :  { %v964_v27 = vsel %vm954_vm7, nan, %v963_v3  ;;  %v1054_v26 = vsel %vm3382_vm10, 0, %v1052_v59  ;;  %v1061_v56 = vxor.u32 2147483648, %v3465_v13  ;;  %v1154_v19 = vsub.s32 4, %v3218_v24 }
 0x2e1   :  { %v1559_v36 = vor.u32 4788187, %v1558_v15  ;;  %v1440_v47 = vshll.u32 %v3603_v57, 30  ;;  %v2395_v12 = vpack.c.bf16 %v964_v27, %v861_v49  ;;  %v1064_v22 = vxor.u32 2147483648, %v3455_v6 }
 0x2e2   :  { %v1562_v31 = vcvt.s32.f32 %v1555_v8  ;;  %v1058_v60 = vand.u32 3, %v1054_v26  ;;  %v1155_v50 = vsel %vm1070_vm11, %v1154_v19, %v3218_v24  ;;  %v1164_v14 = vxor.u32 2147483648, %v3393_v62 }
 0x2e3   :  { %v2531_v40 = vpop.eup %2530  ;;  %v1560_v21 = vand.u32 2147483647, %v1559_v36  ;;  %v3617_v51 = vsub.s32 %v1437_v52, %v1440_v47  ;;  %2396 = vmatprep.subr.bf16.mxu0 %v2395_v12  ;;  %v1157_v63 = vsel %vm3305_vm12, 0, %v1155_v50  ;;  %v1167_v46 = vxor.u32 2147483648, %v3390_v33 }
 0x2e4   :  { %v2533_v54 = vpop.eup %2532  ;;  %2398 = vmatpush3.bf16.msra.mxu0 %v2395_v12  ;;  %vm1059_vm9 = vcmp.lt.s32.totalorder %v1058_v60, 2  ;;  %vm1060_vm10 = vcmp.eq.s32.totalorder %v1058_v60, 0  ;;  %vm1063_vm3 = vcmp.eq.s32.totalorder %v1058_v60, 2  ;;  %v1161_v18 = vand.u32 3, %v1157_v63 }
 0x2e5   :  { %v1563_v41 = vmul.f32 %v1562_v31, %v1560_v21  ;;  %v1443_v24 = vsub.s32 0, %v3617_v51  ;;  %v1062_v42 = vsel %vm1060_vm10, %v3455_v6, %v1061_v56  ;;  %v1065_v49 = vsel %vm1063_vm3, %v1064_v22, %v3465_v13 }
 0x2e6   :  { %vm1482_vm11 = vcmp.lt.s32.totalorder %v3290_v35, 0  ;;  %v1066_v39 = vsel %vm1059_vm9, %v1062_v42, %v1065_v49  ;;  %vm1163_vm7 = vcmp.eq.s32.totalorder %v1161_v18, 0  ;;  %vm1057_vm12 = vweird.f32 %v3049_v17 }
 0x2e7   :  { %v2264_v37 = vmin.u32 %v1443_v24, %v3617_v51  ;;  %v1165_v29 = vsel %vm1163_vm7, %v3390_v33, %v1164_v14  ;;  %vm1166_vm0 = vcmp.eq.s32.totalorder %v1161_v18, 2  ;;  %v1067_v52 = vsel %vm1057_vm12, nan, %v1066_v39 }
 0x2e8   :  { %vm1162_vm2 = vcmp.lt.s32.totalorder %v1161_v18, 2  ;;  %v1168_v28 = vsel %vm1166_vm0, %v1167_v46, %v3393_v62  ;;  %v1257_v4 = vsub.s32 4, %v3449_v43  ;;  %v1564_v6 = vxor.u32 2147483648, %v1563_v41 }
 0x2e9   :  { %v1445_v45 = vclz %v2264_v37  ;;  %vm1160_vm15 = vweird.f32 %v3043_v1  ;;  %v1169_v13 = vsel %vm1162_vm2, %v1165_v29, %v1168_v28  ;;  %v4066_v11 = vand.u32 2147483647, %v3290_v35 }
 0x2ea   :  { %v1170_v17 = vsel %vm1160_vm15, nan, %v1169_v13  ;;  %v1258_v33 = vsel %vm1173_vm6, %v1257_v4, %v3449_v43  ;;  %v1360_v62 = vsub.s32 4, %v3386_v61  ;;  %v1267_v1 = vxor.u32 2147483648, %v2533_v54 }
 0x2eb   :  { %vm3634_vm4 = vcmp.le.f32.partialorder %v4066_v11, 0.7853982  ;;  %v2265_v16 = vadd.s32 4294967294, %v1445_v45  ;;  %v2399_v5 = vpack.c.bf16 %v1170_v17, %v1067_v52  ;;  %v1260_v32 = vsel %vm3533_vm8, 0, %v1258_v33 }
 0x2ec   :  { %v1433_v23 = vadd.s32 %v3563_v58, %v3571_v38  ;;  %v1264_v59 = vand.u32 3, %v1260_v32  ;;  %v1270_v8 = vxor.u32 2147483648, %v2531_v40  ;;  %v1361_v15 = vsel %vm1276_vm13, %v1360_v62, %v3386_v61 }
 0x2ed   :  { %v1565_v43 = vsel %vm1482_vm11, %v1564_v6, %v1563_v41  ;;  %vm2266_vm6 = vcmp.lt.s32.totalorder %v2265_v16, 0  ;;  %2400 = vmatprep.subr.bf16.mxu0 %v2399_v5  ;;  %vm1263_vm5 = vweird.f32 %v3281_v30  ;;  %v1363_v44 = vsel %vm3459_vm1, 0, %v1361_v15  ;;  %v1583_v30 = vld [vmem:[%s4033_s5] sm:$0xff] }
 0x2ee   :  { %v1448_v3 = vsel %vm2266_vm6, 0, %v2265_v16  ;;  %2402 = vmatpush3.bf16.msra.mxu0 %v2399_v5  ;;  %vm1266_vm8 = vcmp.eq.s32.totalorder %v1264_v59, 0  ;;  %v1370_v58 = vxor.u32 2147483648, %v3541_v10  ;;  %v1373_v38 = vxor.u32 2147483648, %v3538_v53 }
 0x2ef   :  { %v1449_v27 = vsub.s32 32, %v1448_v3  ;;  %v1453_v26 = vsub.s32 4294967266, %v1448_v3  ;;  %v1268_v61 = vsel %vm1266_vm8, %v2531_v40, %v1267_v1  ;;  %vm1269_vm13 = vcmp.eq.s32.totalorder %v1264_v59, 2 }
 0x2f0   :  { %v1568_v56 = vsel %vm3634_vm4, %v3290_v35, %v1565_v43  ;;  %vm1265_vm9 = vcmp.lt.s32.totalorder %v1264_v59, 2  ;;  %v1271_v19 = vsel %vm1269_vm13, %v1270_v8, %v2533_v54  ;;  %v1367_v36 = vand.u32 3, %v1363_v44  ;;  %v1584_v43 = vld [vmem:[%s4033_s5 + $0x8] sm:$0xff]  ;;  %v1585_v44 = vld [vmem:[%s4033_s5 + $0x10] sm:$0xff] }
 0x2f1   :  { %v1450_v55 = vshll.u32 %v3617_v51, %v1448_v3  ;;  %v1451_v47 = vshrl.u32 %v1433_v23, %v1449_v27  ;;  %v1454_v12 = vadd.s32 127, %v1453_v26  ;;  %v1272_v22 = vsel %vm1265_vm9, %v1268_v61, %v1271_v19  ;;  %v1599_v3 = vpop.permute.xlu1 %1598 }
 0x2f2   :  { %v1273_v31 = vsel %vm1263_vm5, nan, %v1272_v22  ;;  %vm1368_vm1 = vcmp.lt.s32.totalorder %v1367_v36, 2  ;;  %vm1369_vm10 = vcmp.eq.s32.totalorder %v1367_v36, 0  ;;  %vm1372_vm3 = vcmp.eq.s32.totalorder %v1367_v36, 2 }
 0x2f3   :  { %v1452_v60 = vor.u32 %v1451_v47, %v1450_v55  ;;  %v1455_v50 = vshll.u32 %v1454_v12, 23  ;;  %v1371_v14 = vsel %vm1369_vm10, %v3538_v53, %v1370_v58  ;;  %v1374_v40 = vsel %vm1372_vm3, %v1373_v38, %v3541_v10  ;;  %v1594_v38 = vpop.permute.xlu0 %1593 }
 0x2f4   :  { %vm1366_vm7 = vweird.f32 %v3194_v48  ;;  %v1375_v21 = vsel %vm1368_vm1, %v1371_v14, %v1374_v40  ;;  %2534 = vcosq.f32 %v1568_v56  ;;  %vm1611_vm12 = vcmask 523264  }
 0x2f5   :  { %v1456_v51 = vor.u32 4788187, %v1455_v50  ;;  %v1376_v63 = vsel %vm1366_vm7, nan, %v1375_v21  ;;  %2536 = vsinq.f32 %v1568_v56  ;;  %v1459_v18 = vcvt.s32.f32 %v1452_v60  ;;  %2370 = vmatprep.mubr.msk.f32.mxu0 %vm1611_vm12, %v1583_v30  ;;  %v1609_v36 = vpop.permute.xlu1 %1608 }
 0x2f6   :  { %v2403_v46 = vpack.c.bf16 %v1376_v63, %v1273_v31  ;;  %v1566_v53 = vsub.s32 4, %v3526_v34  ;;  %vm1379_vm0 = vcmp.lt.s32.totalorder %v3370_v25, 0  ;;  %v4069_v24 = vand.u32 2147483647, %v3370_v25 }
 0x2f7   :  { %v1457_v54 = vand.u32 2147483647, %v1456_v51  ;;  %v1463_v39 = vsub.s32 4, %v3603_v57  ;;  %vm1572_vm8 = vweird.f32 %v3290_v35  ;;  %vm1469_vm9 = vweird.f32 %v3370_v25  ;;  %v1586_v35 = vld [vmem:[%s4033_s5 + $0x18] sm:$0xff]  ;;  %v1604_v63 = vpop.permute.xlu0 %1603 }
 0x2f8   :  { %2404 = vmatprep.subr.bf16.mxu0 %v2403_v46  ;;  %v1567_v41 = vsel %vm1482_vm11, %v1566_v53, %v3526_v34  ;;  %vm3676_vm2 = vcmp.le.f32.partialorder %v4069_v24, 0.7853982 }
 0x2f9   :  { %v1460_v10 = vmul.f32 %v1459_v18, %v1457_v54  ;;  %2406 = vmatpush3.bf16.msra.mxu0 %v2403_v46  ;;  %v1569_v52 = vsel %vm3634_vm4, 0, %v1567_v41  ;;  %v1464_v34 = vsel %vm1379_vm0, %v1463_v39, %v3603_v57 }
 0x2fa   :  { %v1573_v4 = vand.u32 3, %v1569_v52  ;;  %v1466_v13 = vsel %vm3676_vm2, 0, %v1464_v34 }
 0x2fb   :  { %v1461_v48 = vxor.u32 2147483648, %v1460_v10  ;;  %v1470_v11 = vand.u32 3, %v1466_v13 }
 0x2fc   :  { %vm1575_vm11 = vcmp.eq.s32.totalorder %v1573_v4, 0  ;;  %vm1578_vm15 = vcmp.eq.s32.totalorder %v1573_v4, 2  ;;  %vm1574_vm6 = vcmp.lt.s32.totalorder %v1573_v4, 2 }
 0x2fd   :  { %v1462_v49 = vsel %vm1379_vm0, %v1461_v48, %v1460_v10  ;;  %vm1475_vm4 = vcmp.eq.s32.totalorder %v1470_v11, 2  ;;  %vm1472_vm5 = vcmp.eq.s32.totalorder %v1470_v11, 0  ;;  %vm1471_vm13 = vcmp.lt.s32.totalorder %v1470_v11, 2 }
 0x2fe   :  { %v1465_v37 = vsel %vm3676_vm2, %v3370_v25, %v1462_v49  ;;  %v2535_v29 = vpop.eup %2534  ;;  %v2589_v25 = vmov 0.0|0.0  }
 0x2ff   :  { %2538 = vcosq.f32 %v1465_v37  ;;  %v2537_v28 = vpop.eup %2536  ;;  %v1579_v45 = vxor.u32 2147483648, %v2535_v29  ;;  %2411 = vmatprep.subr.bf16.mxu1 %v2589_v25 }
 0x300   :  { %2540 = vsinq.f32 %v1465_v37  ;;  %v1576_v6 = vxor.u32 2147483648, %v2537_v28 }
 0x301   :  { %v1580_v33 = vsel %vm1578_vm15, %v1579_v45, %v2537_v28 }
 0x302   :  { %v1577_v17 = vsel %vm1575_vm11, %v2535_v29, %v1576_v6 }
 0x303   :  { %v1581_v5 = vsel %vm1574_vm6, %v1577_v17, %v1580_v33 }
 0x304   :  { %v1582_v23 = vsel %vm1572_vm8, nan, %v1581_v5 }
 0x309   :  { %v2539_v62 = vpop.eup %2538 }
 0x30a   :  { %v2541_v16 = vpop.eup %2540  ;;  %v1476_v20 = vxor.u32 2147483648, %v2539_v62 }
 0x30b   :  { %v1473_v32 = vxor.u32 2147483648, %v2541_v16 }
 0x30c   :  { %v1477_v57 = vsel %vm1475_vm4, %v1476_v20, %v2541_v16  ;;  %v4073_v20 = vmov 2102212464  }
 0x30d   :  { %v1474_v1 = vsel %vm1472_vm5, %v2539_v62, %v1473_v32  ;;  %v4072_v62 = vmov 2131351028  }
 0x30e   :  { %v1478_v59 = vsel %vm1471_vm13, %v1474_v1, %v1477_v57 }
 0x30f   :  { %v1479_v8 = vsel %vm1469_vm9, nan, %v1478_v59 }
 0x310   :  { %v2407_v15 = vpack.c.bf16 %v1582_v23, %v1479_v8 }
 0x312   :  { %2408 = vmatprep.subr.bf16.mxu0 %v2407_v15 }
 0x313   :  { %2410 = vmatpush3.bf16.msra.mxu0 %v2407_v15 }
 0x316   :  { %2371 = vmatmul.mubr.msk.f32.vlgmr.msra.gmra.mrb[4].mxu0 %vm1611_vm12, %v1584_v43 }
 0x317   :  { %2373 = vmatprep.mubr.msk.f32.mxu0 %vm1611_vm12, %v1585_v44 }
 0x31a   :  { %2374 = vmatmul.mubr.msk.f32.gmra.mrb[6].mxu0 %vm1611_vm12, %v1586_v35 }
 0x3e9   :  { %v2372_v58 = vpop.f32.mrb[4].mxu0 }
 0x3ea   :  { %v3704_v27 = vadd.f32 %v2372_v58, %v1599_v3  ;;  %v1690_v26 = vpop.f32.mrb[5].mxu0 }
 0x3eb   :  { %v3706_v61 = vadd.f32 %v1690_v26, %v1594_v38 }
 0x3ec   :  { %v1812_v56 = vand.u32 2147483647, %v3704_v27  ;;  %v1815_v19 = vand.u32 2139095040, %v3704_v27 }
 0x3ed   :  { %v1709_v55 = vand.u32 2147483647, %v3706_v61  ;;  %v1712_v47 = vand.u32 2139095040, %v3706_v61  ;;  %v2375_v12 = vpop.f32.mrb[6].mxu0 }
 0x3ee   :  { %v1816_v22 = vshrl.u32 %v1815_v19, 23  ;;  %v1819_v31 = vand.u32 8388607, %v1812_v56  ;;  %v3714_v60 = vadd.f32 %v2375_v12, %v1609_v36  ;;  %v1700_v50 = vpop.f32.mrb[7].mxu0 }
 0x3ef   :  { %v1713_v14 = vshrl.u32 %v1712_v47, 23  ;;  %v1716_v40 = vand.u32 8388607, %v1709_v55  ;;  %v3720_v53 = vadd.f32 %v1700_v50, %v1604_v63 }
 0x3f0   :  { %v2279_v21 = vadd.s32 4294967169, %v1816_v22  ;;  %v2018_v51 = vand.u32 2147483647, %v3714_v60  ;;  %v2021_v46 = vand.u32 2139095040, %v3714_v60  ;;  %v1820_v54 = vor.u32 8388608, %v1819_v31 }
 0x3f1   :  { %v2275_v30 = vadd.s32 4294967169, %v1713_v14  ;;  %v1717_v10 = vor.u32 8388608, %v1716_v40  ;;  %v1915_v52 = vand.u32 2147483647, %v3720_v53 }
 0x3f2   :  { %v1822_v18 = vadd.s32 1, %v2279_v21  ;;  %v2022_v41 = vshrl.u32 %v2021_v46, 23  ;;  %v3724_v24 = vand.u32 8388607, %v2018_v51  ;;  %v3727_v28 = vshll.u32 %v1820_v54, 8 }
 0x3f3   :  { %v1719_v48 = vadd.s32 1, %v2275_v30  ;;  %v3731_v4 = vshll.u32 %v1717_v10, 8 }
 0x3f4   :  { %vm1823_vm1 = vcmp.gt.s32.totalorder %v1822_v18, 0  ;;  %v2287_v49 = vadd.s32 4294967169, %v2022_v41  ;;  %v2026_v6 = vor.u32 8388608, %v3724_v24 }
 0x3f5   :  { %v1824_v42 = vsel %vm1823_vm1, %v1822_v18, 0  ;;  %vm1720_vm10 = vcmp.gt.s32.totalorder %v1719_v48, 0 }
 0x3f6   :  { %v1825_v39 = vshrl.u32 %v1824_v42, 5  ;;  %v1826_v37 = vand.u32 31, %v1824_v42  ;;  %v1721_v29 = vsel %vm1720_vm10, %v1719_v48, 0  ;;  %v3735_v17 = vadd.s32 1, %v2287_v49 }
 0x3f7   :  { %v3729_v34 = vshrl.u32 %v1721_v29, 5  ;;  %v1723_v11 = vand.u32 31, %v1721_v29  ;;  %vm1814_vm10 = vcmp.lt.s32.totalorder %v3704_v27, 0 }
 0x3f8   :  { %v1827_v45 = vsub.s32 32, %v1826_v37  ;;  %v1829_v13 = vshll.u32 %v2583_v0, %v1826_v37  ;;  %v1832_v33 = vshll.u32 %v2584_v2, %v1826_v37  ;;  %v1835_v16 = vshll.u32 %v4072_v62, %v1826_v37 }
 0x3f9   :  { %v1838_v5 = vshll.u32 %v4073_v20, %v1826_v37  ;;  %v1841_v32 = vshll.u32 %v2587_v9, %v1826_v37  ;;  %vm1844_vm3 = vcmp.lt.s32.totalorder %v1825_v39, 1  ;;  %vm1845_vm7 = vcmp.lt.s32.totalorder %v1825_v39, 2 }
 0x3fa   :  { %v1830_v57 = vshrl.u32 %v2584_v2, %v1827_v45  ;;  %v1833_v1 = vshrl.u32 %v4072_v62, %v1827_v45  ;;  %v1836_v23 = vshrl.u32 %v4073_v20, %v1827_v45  ;;  %v1828_v59 = vshrl.u32 %v2583_v0, %v1827_v45 }
 0x3fb   :  { %v1839_v8 = vshrl.u32 %v2587_v9, %v1827_v45  ;;  %v1842_v15 = vshrl.u32 %v4065_v7, %v1827_v45  ;;  %v1724_v3 = vsub.s32 32, %v1723_v11  ;;  %vm1846_vm12 = vcmp.lt.s32.totalorder %v1825_v39, 3 }
 0x3fc   :  { %v1831_v43 = vor.u32 %v1830_v57, %v1829_v13  ;;  %v1834_v44 = vor.u32 %v1833_v1, %v1832_v33  ;;  %v1837_v35 = vor.u32 %v1836_v23, %v1835_v16  ;;  %vm1847_vm0 = vcmp.lt.s32.totalorder %v1825_v39, 4 }
 0x3fd   :  { %v1840_v58 = vor.u32 %v1839_v8, %v1838_v5  ;;  %v1843_v38 = vor.u32 %v1842_v15, %v1841_v32  ;;  %v1726_v50 = vshll.u32 %v2583_v0, %v1723_v11  ;;  %v1727_v21 = vshrl.u32 %v2584_v2, %v1724_v3 }
 0x3fe   :  { %v1848_v26 = vsel %vm1844_vm3, %v1828_v59, %v1831_v43  ;;  %v1849_v19 = vsel %vm1847_vm0, %v1837_v35, 2102212464  ;;  %v1852_v36 = vsel %vm1844_vm3, %v1831_v43, %v1834_v44  ;;  %v1856_v47 = vsel %vm1844_vm3, %v1834_v44, %v1837_v35 }
 0x3ff   :  { %v1850_v12 = vsel %vm1846_vm12, %v1834_v44, %v1849_v19  ;;  %v1853_v22 = vsel %vm1847_vm0, %v1840_v58, 920167782  ;;  %v1857_v31 = vsel %vm1847_vm0, %v1843_v38, 1326507024  ;;  %v1729_v63 = vshll.u32 %v2584_v2, %v1723_v11 }
 0x400   :  { %v1854_v14 = vsel %vm1846_vm12, %v1837_v35, %v1853_v22  ;;  %v1858_v40 = vsel %vm1846_vm12, %v1840_v58, %v1857_v31  ;;  %v1851_v30 = vsel %vm1845_vm7, %v1848_v26, %v1850_v12  ;;  %v1730_v18 = vshrl.u32 %v4072_v62, %v1724_v3 }
 0x401   :  { %v1855_v46 = vsel %vm1845_vm7, %v1852_v36, %v1854_v14  ;;  %v1859_v54 = vsel %vm1845_vm7, %v1856_v47, %v1858_v40  ;;  %v1728_v49 = vor.u32 %v1727_v21, %v1726_v50  ;;  %v1732_v29 = vshll.u32 %v4072_v62, %v1723_v11 }
 0x402   :  { %v3758_v10 = vmul.u32.u64.low %v3727_v28, %v1859_v54  ;;  %v3759_v48 = vmul.u32.u64.high %v3727_v28, %v1859_v54, %v3758_v10  ;;  %v3762_v41 = vmul.u32.u64.low %v3727_v28, %v1855_v46  ;;  %v3763_v42 = vmul.u32.u64.high %v3727_v28, %v1855_v46, %v3762_v41 }
 0x403   :  { %v1731_v37 = vor.u32 %v1730_v18, %v1729_v63  ;;  %v1733_v45 = vshrl.u32 %v4073_v20, %v1724_v3  ;;  %v1725_v13 = vshrl.u32 %v2583_v0, %v1724_v3  ;;  %v1735_v39 = vshll.u32 %v4073_v20, %v1723_v11 }
 0x404   :  { %v1736_v33 = vshrl.u32 %v2587_v9, %v1724_v3  ;;  %v1739_v16 = vshrl.u32 %v4065_v7, %v1724_v3  ;;  %v1867_v5 = vmul.u32 %v3727_v28, %v1851_v30  ;;  %v1738_v57 = vshll.u32 %v2587_v9, %v1723_v11 }
 0x405   :  { %v1734_v32 = vor.u32 %v1733_v45, %v1732_v29  ;;  %vm1741_vm2 = vcmp.lt.s32.totalorder %v3729_v34, 1  ;;  %vm1869_vm11 = vc.u32 %v3759_v48, %v3762_v41  ;;  %v1870_v1 = vadd.s32 1, %v3763_v42 }
 0x406   :  { %v1737_v23 = vor.u32 %v1736_v33, %v1735_v39  ;;  %vm1742_vm15 = vcmp.lt.s32.totalorder %v3729_v34, 2  ;;  %v1740_v59 = vor.u32 %v1739_v16, %v1738_v57  ;;  %vm1743_vm6 = vcmp.lt.s32.totalorder %v3729_v34, 3 }
 0x407   :  { %vm1744_vm4 = vcmp.lt.s32.totalorder %v3729_v34, 4  ;;  %v1749_v8 = vsel %vm1741_vm2, %v1728_v49, %v1731_v37  ;;  %v1871_v28 = vsel %vm1869_vm11, %v1870_v1, %v3763_v42  ;;  %v1753_v11 = vsel %vm1741_vm2, %v1731_v37, %v1734_v32 }
 0x408   :  { %v1746_v15 = vsel %vm1744_vm4, %v1734_v32, 2102212464  ;;  %v1750_v43 = vsel %vm1744_vm4, %v1737_v23, 920167782  ;;  %v1872_v44 = vadd.s32 %v1871_v28, %v1867_v5  ;;  %v1745_v35 = vsel %vm1741_vm2, %v1725_v13, %v1728_v49 }
 0x409   :  { %v1751_v3 = vsel %vm1743_vm6, %v1734_v32, %v1750_v43  ;;  %v1754_v58 = vsel %vm1744_vm4, %v1740_v59, 1326507024  ;;  %v1747_v38 = vsel %vm1743_vm6, %v1731_v37, %v1746_v15  ;;  %vm2029_vm5 = vcmp.gt.s32.totalorder %v3735_v17, 0 }
 0x40a   :  { %v1752_v26 = vsel %vm1742_vm15, %v1749_v8, %v1751_v3  ;;  %v1755_v19 = vsel %vm1743_vm6, %v1737_v23, %v1754_v58  ;;  %v1873_v36 = vadd.s32 536870912, %v1872_v44  ;;  %v2030_v14 = vsel %vm2029_vm5, %v3735_v17, 0 }
 0x40b   :  { %v1756_v47 = vsel %vm1742_vm15, %v1753_v11, %v1755_v19  ;;  %v3786_v12 = vmul.u32.u64.low %v3731_v4, %v1752_v26  ;;  %v3787_v22 = vmul.u32.u64.high %v3731_v4, %v1752_v26, %v3786_v12  ;;  %v1918_v40 = vand.u32 2139095040, %v3720_v53 }
 0x40c   :  { %v3791_v31 = vmul.u32.u64.low %v3731_v4, %v1756_v47  ;;  %v3792_v50 = vmul.u32.u64.high %v3731_v4, %v1756_v47, %v3791_v31  ;;  %v3796_v21 = vshrl.u32 %v1873_v36, 30  ;;  %v1748_v63 = vsel %vm1742_vm15, %v1745_v35, %v1747_v38 }
 0x40d   :  { %v2032_v30 = vand.u32 31, %v2030_v14  ;;  %v1767_v54 = vadd.s32 1, %v3787_v22  ;;  %v3804_v10 = vand.u32 8388607, %v1915_v52  ;;  %v1764_v42 = vmul.u32 %v3731_v4, %v1748_v63 }
 0x40e   :  { %v1875_v46 = vshll.u32 %v3796_v21, 30  ;;  %vm1766_vm8 = vc.u32 %v3792_v50, %v3786_v12  ;;  %v3811_v17 = vshll.u32 %v2026_v6, 8  ;;  %v1919_v34 = vshrl.u32 %v1918_v40, 23 }
 0x40f   :  { %v2033_v18 = vsub.s32 32, %v2032_v30  ;;  %v1868_v49 = vadd.s32 %v3762_v41, %v3759_v48  ;;  %v1768_v29 = vsel %vm1766_vm8, %v1767_v54, %v3787_v22  ;;  %v2031_v45 = vshrl.u32 %v2030_v14, 5 }
 0x410   :  { %v3814_v37 = vsub.s32 %v1872_v44, %v1875_v46  ;;  %v1769_v13 = vadd.s32 %v1768_v29, %v1764_v42  ;;  %v2035_v39 = vshll.u32 %v2583_v0, %v2032_v30  ;;  %v2038_v24 = vshll.u32 %v2584_v2, %v2032_v30 }
 0x411   :  { %v2036_v4 = vshrl.u32 %v2584_v2, %v2033_v18  ;;  %v2039_v33 = vshrl.u32 %v4072_v62, %v2033_v18  ;;  %v2041_v6 = vshll.u32 %v4072_v62, %v2032_v30  ;;  %v2042_v48 = vshrl.u32 %v4073_v20, %v2033_v18 }
 0x412   :  { %v1878_v16 = vsub.s32 0, %v3814_v37  ;;  %v1770_v41 = vadd.s32 536870912, %v1769_v13  ;;  %v2044_v32 = vshll.u32 %v4073_v20, %v2032_v30  ;;  %v2045_v57 = vshrl.u32 %v2587_v9, %v2033_v18 }
 0x413   :  { %v2037_v5 = vor.u32 %v2036_v4, %v2035_v39  ;;  %v2040_v23 = vor.u32 %v2039_v33, %v2038_v24  ;;  %v2043_v59 = vor.u32 %v2042_v48, %v2041_v6  ;;  %v2048_v8 = vshrl.u32 %v4065_v7, %v2033_v18 }
 0x414   :  { %v2280_v1 = vmin.u32 %v1878_v16, %v3814_v37  ;;  %v3828_v28 = vshrl.u32 %v1770_v41, 30  ;;  %v2046_v15 = vor.u32 %v2045_v57, %v2044_v32  ;;  %v2047_v43 = vshll.u32 %v2587_v9, %v2032_v30 }
 0x415   :  { %v2283_v11 = vadd.s32 4294967169, %v1919_v34  ;;  %v2034_v35 = vshrl.u32 %v2583_v0, %v2033_v18  ;;  %vm2050_vm13 = vcmp.lt.s32.totalorder %v2031_v45, 1  ;;  %vm2052_vm9 = vcmp.lt.s32.totalorder %v2031_v45, 3 }
 0x416   :  { %v1880_v44 = vclz %v2280_v1  ;;  %v1772_v3 = vshll.u32 %v3828_v28, 30  ;;  %v2049_v58 = vor.u32 %v2048_v8, %v2047_v43  ;;  %vm2053_vm1 = vcmp.lt.s32.totalorder %v2031_v45, 4 }
 0x417   :  { %v2055_v26 = vsel %vm2053_vm1, %v2043_v59, 2102212464  ;;  %v2058_v19 = vsel %vm2050_vm13, %v2037_v5, %v2040_v23  ;;  %v2059_v36 = vsel %vm2053_vm1, %v2046_v15, 920167782  ;;  %v1898_v47 = vsub.s32 4, %v3796_v21 }
 0x418   :  { %v2281_v38 = vadd.s32 4294967294, %v1880_v44  ;;  %v3838_v22 = vsub.s32 %v1769_v13, %v1772_v3  ;;  %vm2051_vm3 = vcmp.lt.s32.totalorder %v2031_v45, 2  ;;  %v2060_v31 = vsel %vm2052_vm9, %v2043_v59, %v2059_v36 }
 0x419   :  { %v2054_v14 = vsel %vm2050_vm13, %v2034_v35, %v2037_v5  ;;  %v2061_v40 = vsel %vm2051_vm3, %v2058_v19, %v2060_v31  ;;  %v2062_v63 = vsel %vm2050_vm13, %v2040_v23, %v2043_v59  ;;  %v2056_v54 = vsel %vm2052_vm9, %v2040_v23, %v2055_v26 }
 0x41a   :  { %vm2282_vm7 = vcmp.lt.s32.totalorder %v2281_v38, 0  ;;  %v1775_v46 = vsub.s32 0, %v3838_v22  ;;  %v2063_v18 = vsel %vm2053_vm1, %v2049_v58, 1326507024  ;;  %vm3849_vm12 = vcmp.le.f32.partialorder %v1812_v56, 0.7853982 }
 0x41b   :  { %v1883_v30 = vsel %vm2282_vm7, 0, %v2281_v38  ;;  %v2064_v39 = vsel %vm2052_vm9, %v2046_v15, %v2063_v18  ;;  %vm1711_vm0 = vcmp.lt.s32.totalorder %v3706_v61, 0  ;;  %v2057_v5 = vsel %vm2051_vm3, %v2054_v14, %v2056_v54 }
 0x41c   :  { %v1884_v34 = vsub.s32 32, %v1883_v30  ;;  %v1885_v29 = vshll.u32 %v3814_v37, %v1883_v30  ;;  %v1888_v13 = vsub.s32 4294967266, %v1883_v30  ;;  %v2276_v4 = vmin.u32 %v1775_v46, %v3838_v22 }
 0x41d   :  { %v2065_v33 = vsel %vm2051_vm3, %v2062_v63, %v2064_v39  ;;  %v3859_v16 = vmul.u32.u64.low %v3811_v17, %v2061_v40  ;;  %v3860_v24 = vmul.u32.u64.high %v3811_v17, %v2061_v40, %v3859_v16  ;;  %v1923_v32 = vor.u32 8388608, %v3804_v10 }
 0x41e   :  { %v1886_v56 = vshrl.u32 %v1868_v49, %v1884_v34  ;;  %v1889_v6 = vadd.s32 127, %v1888_v13  ;;  %v3864_v48 = vmul.u32.u64.low %v3811_v17, %v2065_v33  ;;  %v3865_v41 = vmul.u32.u64.high %v3811_v17, %v2065_v33, %v3864_v48 }
 0x41f   :  { %v1777_v37 = vclz %v2276_v4  ;;  %v1925_v57 = vadd.s32 1, %v2283_v11  ;;  %v1765_v59 = vadd.s32 %v3786_v12, %v3792_v50  ;;  %v1899_v49 = vsel %vm1814_vm10, %v1898_v47, %v3796_v21 }
 0x420   :  { %v1887_v1 = vor.u32 %v1886_v56, %v1885_v29  ;;  %v1890_v23 = vshll.u32 %v1889_v6, 23  ;;  %v2076_v15 = vadd.s32 1, %v3860_v24  ;;  %vm2590_vm11 = vmmov 0  }
 0x421   :  { %v2277_v8 = vadd.s32 4294967294, %v1777_v37  ;;  %vm1926_vm2 = vcmp.gt.s32.totalorder %v1925_v57, 0  ;;  %v2591_v43 = vmov 0.0   ;;  %v1795_v10 = vsub.s32 4, %v3828_v28 }
 0x422   :  { %2384 = vmatprep.mubr.msk.f32.mxu1 %vm2590_vm11, %v2591_v43  ;;  %v1891_v45 = vor.u32 4788187, %v1890_v23  ;;  %v2073_v11 = vmul.u32 %v3811_v17, %v2057_v5  ;;  %vm2075_vm15 = vc.u32 %v3865_v41, %v3859_v16  ;;  %v1894_v12 = vcvt.s32.f32 %v1887_v1 }
 0x423   :  { %vm2278_vm6 = vcmp.lt.s32.totalorder %v2277_v8, 0  ;;  %v2077_v50 = vsel %vm2075_vm15, %v2076_v15, %v3860_v24  ;;  %v1927_v21 = vsel %vm1926_vm2, %v1925_v57, 0  ;;  %v1901_v38 = vsel %vm3849_vm12, 0, %v1899_v49 }
 0x424   :  { %v1892_v44 = vand.u32 2147483647, %v1891_v45  ;;  %v1780_v35 = vsel %vm2278_vm6, 0, %v2277_v8  ;;  %v2078_v3 = vadd.s32 %v2077_v50, %v2073_v11  ;;  %v3880_v58 = vshrl.u32 %v1927_v21, 5 }
 0x425   :  { %v1781_v26 = vsub.s32 32, %v1780_v35  ;;  %v1785_v19 = vsub.s32 4294967266, %v1780_v35  ;;  %v1929_v36 = vand.u32 31, %v1927_v21  ;;  %v3887_v47 = vsel %vm1711_vm0, %v1795_v10, %v3828_v28 }
 0x426   :  { %v1895_v17 = vmul.f32 %v1894_v12, %v1892_v44  ;;  %v2079_v31 = vadd.s32 536870912, %v2078_v3  ;;  %v3889_v14 = vshll.u32 %v1923_v32, 8  ;;  %v1782_v40 = vshll.u32 %v3838_v22, %v1780_v35 }
 0x427   :  { %v1783_v63 = vshrl.u32 %v1765_v59, %v1781_v26  ;;  %v1786_v30 = vadd.s32 127, %v1785_v19  ;;  %v1930_v46 = vsub.s32 32, %v1929_v36  ;;  %vm1947_vm4 = vcmp.lt.s32.totalorder %v3880_v58, 1 }
 0x428   :  { %v1896_v54 = vxor.u32 2147483648, %v1895_v17  ;;  %v3892_v18 = vshrl.u32 %v2079_v31, 30  ;;  %v3895_v34 = vand.u32 3, %v1901_v38  ;;  %v1932_v28 = vshll.u32 %v2583_v0, %v1929_v36 }
 0x429   :  { %v1784_v29 = vor.u32 %v1783_v63, %v1782_v40  ;;  %v1787_v13 = vshll.u32 %v1786_v30, 23  ;;  %v1933_v39 = vshrl.u32 %v2584_v2, %v1930_v46  ;;  %v1935_v33 = vshll.u32 %v2584_v2, %v1929_v36 }
 0x42a   :  { %v1897_v4 = vsel %vm1814_vm10, %v1896_v54, %v1895_v17  ;;  %v2081_v22 = vshll.u32 %v3892_v18, 30  ;;  %v1936_v24 = vshrl.u32 %v4072_v62, %v1930_v46  ;;  %vm1948_vm5 = vcmp.lt.s32.totalorder %v3880_v58, 2 }
 0x42b   :  { %v1900_v56 = vsel %vm3849_vm12, %v3704_v27, %v1897_v4  ;;  %vm3910_vm8 = vcmp.le.f32.partialorder %v1709_v55, 0.7853982  ;;  %v1788_v48 = vor.u32 4788187, %v1787_v13  ;;  %v1931_v37 = vshrl.u32 %v2583_v0, %v1930_v46 }
 0x42c   :  { %v1938_v5 = vshll.u32 %v4072_v62, %v1929_v36  ;;  %2542 = vcosq.f32 %v1900_v56  ;;  %v1791_v2 = vcvt.s32.f32 %v1784_v29  ;;  %v3916_v32 = vsub.s32 %v2078_v3, %v2081_v22 }
 0x42d   :  { %v1934_v57 = vor.u32 %v1933_v39, %v1932_v28  ;;  %2544 = vsinq.f32 %v1900_v56  ;;  %v1789_v1 = vand.u32 2147483647, %v1788_v48  ;;  %v1937_v42 = vor.u32 %v1936_v24, %v1935_v33 }
 0x42e   :  { %v1939_v23 = vshrl.u32 %v4073_v20, %v1930_v46  ;;  %v2084_v55 = vsub.s32 0, %v3916_v32  ;;  %v1941_v59 = vshll.u32 %v4073_v20, %v1929_v36  ;;  %v1942_v49 = vshrl.u32 %v2587_v9, %v1930_v46 }
 0x42f   :  { %v1944_v0 = vshll.u32 %v2587_v9, %v1929_v36  ;;  %v1792_v8 = vmul.f32 %v1791_v2, %v1789_v1  ;;  %v1945_v15 = vshrl.u32 %v4065_v7, %v1930_v46  ;;  %vm1949_vm13 = vcmp.lt.s32.totalorder %v3880_v58, 3 }
 0x430   :  { %v1940_v62 = vor.u32 %v1939_v23, %v1938_v5  ;;  %v2288_v43 = vmin.u32 %v2084_v55, %v3916_v32  ;;  %v1943_v45 = vor.u32 %v1942_v49, %v1941_v59  ;;  %vm1950_vm9 = vcmp.lt.s32.totalorder %v3880_v58, 4 }
 0x431   :  { %v1951_v10 = vsel %vm1947_vm4, %v1931_v37, %v1934_v57  ;;  %v1793_v11 = vxor.u32 2147483648, %v1792_v8  ;;  %v1946_v20 = vor.u32 %v1945_v15, %v1944_v0  ;;  %v1955_v9 = vsel %vm1947_vm4, %v1934_v57, %v1937_v42 }
 0x432   :  { %v1952_v12 = vsel %vm1950_vm9, %v1940_v62, 2102212464  ;;  %v2086_v50 = vclz %v2288_v43  ;;  %v1956_v21 = vsel %vm1950_vm9, %v1943_v45, 920167782  ;;  %v1959_v44 = vsel %vm1947_vm4, %v1937_v42, %v1940_v62 }
 0x433   :  { %v1953_v7 = vsel %vm1949_vm13, %v1937_v42, %v1952_v12  ;;  %v1794_v35 = vsel %vm1711_vm0, %v1793_v11, %v1792_v8  ;;  %v1957_v38 = vsel %vm1949_vm13, %v1940_v62, %v1956_v21  ;;  %v1960_v26 = vsel %vm1950_vm9, %v1946_v20, 1326507024 }
 0x434   :  { %v1954_v3 = vsel %vm1948_vm5, %v1951_v10, %v1953_v7  ;;  %v1797_v19 = vsel %vm3910_vm8, %v3706_v61, %v1794_v35  ;;  %v2289_v36 = vadd.s32 4294967294, %v2086_v50  ;;  %v1958_v17 = vsel %vm1948_vm5, %v1955_v9, %v1957_v38 }
 0x435   :  { %v1961_v31 = vsel %vm1949_vm13, %v1943_v45, %v1960_v26  ;;  %2546 = vcosq.f32 %v1797_v19  ;;  %v3951_v63 = vmul.u32.u64.low %v3889_v14, %v1958_v17  ;;  %v3952_v30 = vmul.u32.u64.high %v3889_v14, %v1958_v17, %v3951_v63 }
 0x436   :  { %v1962_v40 = vsel %vm1948_vm5, %v1959_v44, %v1961_v31  ;;  %v2543_v46 = vpop.eup %2542  ;;  %2548 = vsinq.f32 %v1797_v19  ;;  %vm2290_vm1 = vcmp.lt.s32.totalorder %v2289_v36, 0  ;;  %v1798_v39 = vsel %vm3910_vm8, 0, %v3887_v47 }
 0x437   :  { %v3956_v54 = vmul.u32.u64.low %v3889_v14, %v1962_v40  ;;  %v3957_v29 = vmul.u32.u64.high %v3889_v14, %v1962_v40, %v3956_v54  ;;  %v2545_v13 = vpop.eup %2544  ;;  %v2089_v28 = vsel %vm2290_vm1, 0, %v2289_v36  ;;  %v1970_v4 = vmul.u32 %v3889_v14, %v1954_v3 }
 0x438   :  { %v2094_v58 = vsub.s32 4294967266, %v2089_v28  ;;  %vm1904_vm10 = vweird.f32 %v3704_v27  ;;  %v2090_v22 = vsub.s32 32, %v2089_v28  ;;  %v1973_v33 = vadd.s32 1, %v3952_v30 }
 0x439   :  { %v1908_v24 = vxor.u32 2147483648, %v2545_v13  ;;  %v1911_v56 = vxor.u32 2147483648, %v2543_v46  ;;  %vm1972_vm3 = vc.u32 %v3957_v29, %v3951_v63  ;;  %vm1907_vm7 = vcmp.eq.s32.totalorder %v3895_v34, 0 }
 0x43a   :  { %v2095_v48 = vadd.s32 127, %v2094_v58  ;;  %vm1910_vm12 = vcmp.eq.s32.totalorder %v3895_v34, 2  ;;  %v1974_v47 = vsel %vm1972_vm3, %v1973_v33, %v3952_v30  ;;  %vm1906_vm0 = vcmp.lt.s32.totalorder %v3895_v34, 2 }
 0x43b   :  { %v1909_v14 = vsel %vm1907_vm7, %v2543_v46, %v1908_v24  ;;  %v1912_v6 = vsel %vm1910_vm12, %v1911_v56, %v2545_v13  ;;  %v2074_v37 = vadd.s32 %v3859_v16, %v3865_v41  ;;  %v1975_v2 = vadd.s32 %v1974_v47, %v1970_v4 }
 0x43c   :  { %v2096_v5 = vshll.u32 %v2095_v48, 23  ;;  %v1913_v57 = vsel %vm1906_vm0, %v1909_v14, %v1912_v6  ;;  %v1802_v1 = vand.u32 3, %v1798_v39  ;;  %v2091_v0 = vshll.u32 %v3916_v32, %v2089_v28 }
 0x43d   :  { %v1914_v42 = vsel %vm1904_vm10, nan, %v1913_v57  ;;  %v2092_v23 = vshrl.u32 %v2074_v37, %v2090_v22  ;;  %v1976_v55 = vadd.s32 536870912, %v1975_v2  ;;  %vm1801_vm6 = vweird.f32 %v3706_v61 }
 0x43e   :  { %v2097_v8 = vor.u32 4788187, %v2096_v5  ;;  %vm1807_vm2 = vcmp.eq.s32.totalorder %v1802_v1, 2  ;;  %vm1804_vm11 = vcmp.eq.s32.totalorder %v1802_v1, 0  ;;  %vm1803_vm15 = vcmp.lt.s32.totalorder %v1802_v1, 2 }
 0x43f   :  { %v2547_v59 = vpop.eup %2546  ;;  %v1977_v34 = vshrl.u32 %v1976_v55, 30  ;;  %v2093_v43 = vor.u32 %v2092_v23, %v2091_v0  ;;  %vm2020_vm5 = vcmp.lt.s32.totalorder %v3714_v60, 0  ;;  %v1971_v38 = vadd.s32 %v3951_v63, %v3957_v29 }
 0x440   :  { %v2549_v49 = vpop.eup %2548  ;;  %v1808_v62 = vxor.u32 2147483648, %v2547_v59  ;;  %v2098_v10 = vand.u32 2147483647, %v2097_v8  ;;  %vm3985_vm8 = vcmp.le.f32.partialorder %v2018_v51, 0.7853982  ;;  %v2104_v13 = vsub.s32 4, %v3892_v18 }
 0x441   :  { %v1805_v15 = vxor.u32 2147483648, %v2549_v49  ;;  %v1978_v16 = vshll.u32 %v1977_v34, 30  ;;  %v2100_v12 = vcvt.s32.f32 %v2093_v43  ;;  %vm1917_vm13 = vcmp.lt.s32.totalorder %v3720_v53, 0 }
 0x442   :  { %v1809_v41 = vsel %vm1807_vm2, %v1808_v62, %v2549_v49  ;;  %v2105_v39 = vsel %vm2020_vm5, %v2104_v13, %v3892_v18  ;;  %vm3999_vm9 = vcmp.le.f32.partialorder %v1915_v52, 0.7853982  ;;  %v2001_v22 = vsub.s32 4, %v1977_v34 }
 0x443   :  { %v1806_v45 = vsel %vm1804_vm11, %v2547_v59, %v1805_v15  ;;  %v1979_v27 = vsub.s32 %v1975_v2, %v1978_v16  ;;  %v2101_v50 = vmul.f32 %v2100_v12, %v2098_v10  ;;  %v2107_v56 = vsel %vm3985_vm8, 0, %v2105_v39  ;;  %v2121_v15 = vld [vmem:[%s4035_s7] sm:$0x1] }
 0x444   :  { %v1810_v11 = vsel %vm1803_vm15, %v1806_v45, %v1809_v41  ;;  %v2002_v48 = vsel %vm1917_vm13, %v2001_v22, %v1977_v34  ;;  %v2111_v47 = vand.u32 3, %v2107_v56  ;;  %vm2110_vm0 = vweird.f32 %v3714_v60 }
 0x445   :  { %v1811_v20 = vsel %vm1801_vm6, nan, %v1810_v11  ;;  %v1981_v9 = vsub.s32 0, %v1979_v27  ;;  %v2102_v44 = vxor.u32 2147483648, %v2101_v50  ;;  %v2004_v6 = vsel %vm3999_vm9, 0, %v2002_v48 }
 0x446   :  { %v2412_v32 = vpack.c.bf16 %v1914_v42, %v1811_v20  ;;  %vm2113_vm1 = vcmp.eq.s32.totalorder %v2111_v47, 0  ;;  %vm2116_vm10 = vcmp.eq.s32.totalorder %v2111_v47, 2  ;;  %v2008_v37 = vand.u32 3, %v2004_v6 }
 0x447   :  { %v2284_v7 = vmin.u32 %v1981_v9, %v1979_v27  ;;  %v2103_v61 = vsel %vm2020_vm5, %v2102_v44, %v2101_v50  ;;  %vm2112_vm3 = vcmp.lt.s32.totalorder %v2111_v47, 2  ;;  %vm2007_vm11 = vweird.f32 %v3720_v53 }
 0x448   :  { %2413 = vmatpush3.bf16.msra.mxu1 %v2412_v32  ;;  %v2106_v40 = vsel %vm3985_vm8, %v3714_v60, %v2103_v61  ;;  %vm2013_vm7 = vcmp.eq.s32.totalorder %v2008_v37, 2  ;;  %vm2010_vm12 = vcmp.eq.s32.totalorder %v2008_v37, 0  ;;  %vm2009_vm2 = vcmp.lt.s32.totalorder %v2008_v37, 2 }
 0x449   :  { %2414 = vmatprep.subr.bf16.mxu1 %v2589_v25  ;;  %v1983_v21 = vclz %v2284_v7  ;;  %2550 = vcosq.f32 %v2106_v40 }
 0x44a   :  { %2552 = vsinq.f32 %v2106_v40 }
 0x44b   :  { %v2285_v35 = vadd.s32 4294967294, %v1983_v21 }
 0x44d   :  { %vm2286_vm4 = vcmp.lt.s32.totalorder %v2285_v35, 0 }
 0x44e   :  { %v1986_v3 = vsel %vm2286_vm4, 0, %v2285_v35 }
 0x44f   :  { %v1987_v26 = vsub.s32 32, %v1986_v3  ;;  %v1991_v19 = vsub.s32 4294967266, %v1986_v3  ;;  %v1988_v25 = vshll.u32 %v1979_v27, %v1986_v3 }
 0x451   :  { %v1989_v17 = vshrl.u32 %v1971_v38, %v1987_v26  ;;  %v1992_v31 = vadd.s32 127, %v1991_v19 }
 0x453   :  { %v1990_v30 = vor.u32 %v1989_v17, %v1988_v25  ;;  %v1993_v46 = vshll.u32 %v1992_v31, 23  ;;  %v2551_v24 = vpop.eup %2550 }
 0x454   :  { %v2553_v18 = vpop.eup %2552  ;;  %v2117_v52 = vxor.u32 2147483648, %v2551_v24 }
 0x455   :  { %v1994_v54 = vor.u32 4788187, %v1993_v46  ;;  %v1997_v29 = vcvt.s32.f32 %v1990_v30  ;;  %v2114_v14 = vxor.u32 2147483648, %v2553_v18 }
 0x456   :  { %v2118_v2 = vsel %vm2116_vm10, %v2117_v52, %v2553_v18 }
 0x457   :  { %v1995_v63 = vand.u32 2147483647, %v1994_v54  ;;  %v2115_v5 = vsel %vm2113_vm1, %v2551_v24, %v2114_v14 }
 0x458   :  { %v2119_v23 = vsel %vm2112_vm3, %v2115_v5, %v2118_v2 }
 0x459   :  { %v1998_v51 = vmul.f32 %v1997_v29, %v1995_v63  ;;  %v2120_v0 = vsel %vm2110_vm0, nan, %v2119_v23 }
 0x45b   :  { %v1999_v28 = vxor.u32 2147483648, %v1998_v51 }
 0x45d   :  { %v2000_v4 = vsel %vm1917_vm13, %v1999_v28, %v1998_v51 }
 0x45e   :  { %v2003_v33 = vsel %vm3999_vm9, %v3720_v53, %v2000_v4 }
 0x45f   :  { %2554 = vcosq.f32 %v2003_v33 }
 0x460   :  { %2556 = vsinq.f32 %v2003_v33 }
 0x469   :  { %v2555_v57 = vpop.eup %2554 }
 0x46a   :  { %v2557_v1 = vpop.eup %2556  ;;  %v2014_v42 = vxor.u32 2147483648, %v2555_v57 }
 0x46b   :  { %v2011_v55 = vxor.u32 2147483648, %v2557_v1 }
 0x46c   :  { %v2015_v59 = vsel %vm2013_vm7, %v2014_v42, %v2557_v1 }
 0x46d   :  { %v2012_v49 = vsel %vm2010_vm12, %v2555_v57, %v2011_v55 }
 0x46e   :  { %v2016_v8 = vsel %vm2009_vm2, %v2012_v49, %v2015_v59 }
 0x46f   :  { %v2017_v34 = vsel %vm2007_vm11, nan, %v2016_v8 }
 0x470   :  { %v2415_v62 = vpack.c.bf16 %v2120_v0, %v2017_v34 }
 0x472   :  { %2416 = vmatpush3.bf16.msra.mxu1 %v2415_v62 }
 0x475   :  { %2385 = vmatmul.mubr.msk.f32.vlgmr.msra.gmra.mrb[8].mxu1 %vm629_vm14, %v2121_v15 }
 0x548   :  { %v2191_v43 = vpop.f32.mrb[8].mxu1 }
 0x549   :  { %2195 = vst [vmem:[#allocation2] sm:$0x1] %v2191_v43  ;;  %v2386_v60 = vpop.f32.mrb[9].mxu1 }
 0x54a   :  { %2569 = shalt.err (!%p2566_p4)
}
 0x54b   :  { %s2570_s7 = scalar_lea.hbm %s4036_s8, 16 }
 0x54c   :  { %p2571_p5 = scmp.ne.s32.totalorder %s4036_s8, %s2570_s7  ;;  %p2574_p6 = scmp.lt.u32.totalorder %s2570_s7, %s4036_s8 }
 0x54e   :  { %p2576_p7 = pnand %p2574_p6, %p2571_p5 }
 0x550   :  { %2579 = shalt.err (!%p2576_p7)
}
 0x551   :  { %2205 = dma.vmem_to_hbm [thread:$0]  %s2203_s19, 16, %s4036_s8, [#allocation3]  }
 0x552   :  { %2580 = dma.done.wait [#allocation3], 16  }
 0x553   :  { %2581 = vsyncadd [#allocation3], 4294967280 }
 0x554   :  { %2209 = vsyncpa [#allocation3], 1 }

</bundles_post_ra>
